<compile_context>
chip_gen: v6e
topology: v6e:2x2x1
jax: 0.10.0
libtpu: 0.0.40
codegen_flags: <defaults>
</compile_context>

<pallas_src>
import functools

import jax
import jax.numpy as jnp
from jax.experimental import pallas as pl
from jax.experimental.pallas import tpu as pltpu


# ----------------------------------------------------------------------------
# Fused Pallas kernel: backbone conv -> classifier conv -> bilinear upsample
# ----------------------------------------------------------------------------
def fused_seg_kernel(patches_ref, wbb_ref, bbb_ref, wcls_ref, bcls_ref, up_ref, o_ref):
    """All operands resident in VMEM, no grid.

    patches_ref : [9*Cin, M]       bf16  im2col'd input (transposed), M = N*Ho*Wo
    wbb_ref     : [hidden, 9*Cin]  bf16  backbone 3x3 conv weights (transposed)
    bbb_ref     : [hidden, 1]      f32   backbone bias
    wcls_ref    : [nc, hidden]     bf16  classifier 1x1 conv weights (transposed)
    bcls_ref    : [nc, 1]          f32   classifier bias
    up_ref      : [M, N*H*W]       bf16  kron(I_N, Ah x Aw)^T bilinear matrix
    o_ref       : [nc, N*H*W]      f32   upsampled logits, class-major, lane-dense
    """
    # --- backbone: 3x3/s2 conv as matmul + bias + ReLU (f32 accumulate) ------
    feat = jnp.dot(wbb_ref[...], patches_ref[...],
                   preferred_element_type=jnp.float32)            # [hidden, M]
    feat = jnp.maximum(feat + bbb_ref[...], 0.0)

    # --- classifier: 1x1 conv as matmul + bias --------------------------------
    logits = jnp.dot(wcls_ref[...], feat.astype(jnp.bfloat16),
                     preferred_element_type=jnp.float32)          # [nc, M]
    logits = logits + bcls_ref[...]

    # --- bilinear upsample of every (n, class) plane in ONE matmul ------------
    o_ref[...] = jnp.dot(logits.astype(jnp.bfloat16), up_ref[...],
                         preferred_element_type=jnp.float32)      # [nc, N*H*W]


def fused_forward_call(patches_t, w_bb_t, b_bb, w_cls_t, b_cls, up_mat,
                       *, num_classes, out_cols):
    vmem = pl.BlockSpec(memory_space=pltpu.MemorySpace.VMEM)
    return pl.pallas_call(
        fused_seg_kernel,
        out_shape=jax.ShapeDtypeStruct((num_classes, out_cols), jnp.float32),
        in_specs=[vmem] * 6,
        out_specs=vmem,
    )(patches_t, w_bb_t, b_bb, w_cls_t, b_cls, up_mat)


# ----------------------------------------------------------------------------
# Wrapper-side layout plumbing (cheap at these shapes)
# ----------------------------------------------------------------------------
def im2col_3x3_s2_p1(x_nchw):
    """x: [N, Cin, H, W] -> patches [N*Ho*Wo, 9*Cin] (column order kh, kw, cin)."""
    N, Cin, H, W = x_nchw.shape
    Ho = (H + 2 - 3) // 2 + 1
    Wo = (W + 2 - 3) // 2 + 1
    x_nhwc = jnp.transpose(x_nchw, (0, 2, 3, 1))
    xp = jnp.pad(x_nhwc, ((0, 0), (1, 1), (1, 1), (0, 0)))
    cols = []
    for kh in range(3):
        for kw in range(3):
            cols.append(xp[:, kh:kh + 2 * Ho:2, kw:kw + 2 * Wo:2, :])  # [N, Ho, Wo, Cin]
    patches = jnp.concatenate(cols, axis=-1)                           # [N, Ho, Wo, 9*Cin]
    return patches.reshape(N * Ho * Wo, 9 * Cin), (N, Ho, Wo)


def bilinear_matrix(out_size, in_size):
    """PyTorch F.interpolate(mode='bilinear', align_corners=False) 1-D weights."""
    scale = in_size / out_size
    dst = jnp.arange(out_size, dtype=jnp.float32)
    src = jnp.clip((dst + 0.5) * scale - 0.5, 0.0, None)
    i0 = jnp.clip(jnp.floor(src).astype(jnp.int32), 0, in_size - 1)
    i1 = jnp.minimum(i0 + 1, in_size - 1)
    lam = src - i0.astype(jnp.float32)
    rows = jnp.arange(out_size)
    A = jnp.zeros((out_size, in_size), jnp.float32)
    A = A.at[rows, i0].add(1.0 - lam)
    A = A.at[rows, i1].add(lam)
    return A


def init_params(key, cin, hidden, num_classes):
    """Synthetic backbone/classifier params, stored in the transposed layouts
    the fused kernel consumes (master copies in f32)."""
    k1, k2, k3, k4 = jax.random.split(key, 4)
    return {
        "w_bb_t": jax.random.normal(k1, (hidden, 9 * cin), jnp.float32) * 0.1,
        "b_bb":   jax.random.normal(k2, (hidden, 1), jnp.float32) * 0.1,
        "w_cls_t": jax.random.normal(k3, (num_classes, hidden), jnp.float32) * 0.1,
        "b_cls":  jax.random.normal(k4, (num_classes, 1), jnp.float32) * 0.1,
    }


def simple_segmentation_forward(params, x_nchw):
    """Mirrors SimpleSegmentationModel.forward: backbone -> classifier -> bilinear
    resize to the input spatial size. Returns NCHW [N, num_classes, H, W] f32."""
    N, Cin, H, W = x_nchw.shape
    num_classes = params["w_cls_t"].shape[0]

    # im2col for the 3x3/s2 backbone conv (tiny here; see TODO at top for real sizes).
    patches, (_, Ho, Wo) = im2col_3x3_s2_p1(x_nchw)          # [N*Ho*Wo, 9*Cin]
    M = N * Ho * Wo

    # Transposed, bf16 MXU operands (layout plumbing only).
    patches_t = patches.T.astype(jnp.bfloat16)               # [9*Cin, M]   lane dim = M
    w_bb_t = params["w_bb_t"].astype(jnp.bfloat16)
    w_cls_t = params["w_cls_t"].astype(jnp.bfloat16)

    # F.interpolate(mode='bilinear', align_corners=False) as one matmul:
    # up = logits[nc, N*Ho*Wo] @ kron(I_N, Ah x Aw)^T  -> [nc, N*H*W]
    Ah = bilinear_matrix(H, Ho)                              # [H, Ho]
    Aw = bilinear_matrix(W, Wo)                              # [W, Wo]
    AhAw = jnp.einsum("Hh,Ww->HWhw", Ah, Aw).reshape(H * W, Ho * Wo)
    up_mat = jnp.kron(jnp.eye(N, dtype=jnp.float32), AhAw).T.astype(jnp.bfloat16)  # [M, N*H*W]

    out_flat = fused_forward_call(
        patches_t, w_bb_t, params["b_bb"], w_cls_t, params["b_cls"], up_mat,
        num_classes=num_classes, out_cols=N * H * W)         # [nc, N*H*W]

    # Lane-dense kernel output -> NCHW (wrapper-side reshape/transpose of 12 KB).
    return out_flat.reshape(num_classes, N, H, W).transpose(1, 0, 2, 3)


# ----------------------------------------------------------------------------
if __name__ == "__main__":
    N, Cin, H, W = 2, 4, 16, 16
    hidden, num_classes = 32, 6

    key = jax.random.PRNGKey(0)
    kx, kp = jax.random.split(key)
    x = jax.random.normal(kx, (N, Cin, H, W), jnp.float32)
    params = init_params(kp, Cin, hidden, num_classes)

    forward = jax.jit(simple_segmentation_forward)
    out = forward(params, x)
    out = jax.block_until_ready(out)

    assert out.shape == (N, num_classes, H, W), out.shape
    assert out.dtype == jnp.float32
    print("KERNEL_OK")
</pallas_src>

<mosaic_0001>
module attributes {stable_mosaic.version = 11 : i64} {
  func.func private @main(%arg0: i32) attributes {dimension_semantics = [#tpu.dimension_semantics<core_parallel>], iteration_bounds = array<i64: 2>, tpu.core_type = #tpu.core_type<sc_scalar_subcore>, window_params = []} {
    return
  }
}

module attributes {stable_mosaic.version = 11 : i64} {
  func.func private @main(%arg0: i32) attributes {dimension_semantics = [#tpu.dimension_semantics<core_parallel>], iteration_bounds = array<i64: 2>, tpu.core_type = #tpu.core_type<sc_scalar_subcore>, window_params = []} {
    return
  }
}

module attributes {stable_mosaic.version = 11 : i64} {
  func.func @fused_seg_kernel(%arg0: memref<36x128xbf16, #tpu.memory_space<vmem>>, %arg1: memref<32x36xbf16, #tpu.memory_space<vmem>>, %arg2: memref<32x1xf32, #tpu.memory_space<vmem>>, %arg3: memref<6x32xbf16, #tpu.memory_space<vmem>>, %arg4: memref<6x1xf32, #tpu.memory_space<vmem>>, %arg5: memref<128x512xbf16, #tpu.memory_space<vmem>>, %arg6: memref<6x512xf32, #tpu.memory_space<vmem>>) attributes {dimension_semantics = [], scalar_prefetch = 0 : i64, scratch_operands = 0 : i64, tpu.core_type = #tpu.core_type<tc>} {
    %c0 = arith.constant 0 : index
    %c0_0 = arith.constant 0 : index
    %0 = vector.load %arg1[%c0, %c0_0] : memref<32x36xbf16, #tpu.memory_space<vmem>>, vector<32x36xbf16>
    %c0_1 = arith.constant 0 : index
    %c0_2 = arith.constant 0 : index
    %1 = vector.load %arg0[%c0_1, %c0_2] : memref<36x128xbf16, #tpu.memory_space<vmem>>, vector<36x128xbf16>
    %cst = arith.constant dense<0.000000e+00> : vector<32x128xf32>
    %2 = tpu.matmul %0, %1, %cst {dimension_numbers = #tpu.dot_dimension_numbers<[1], [0], [0], [1], [0, 0, 1, 1], [], []>} : vector<32x36xbf16>, vector<36x128xbf16>, vector<32x128xf32> -> vector<32x128xf32>
    %c0_3 = arith.constant 0 : index
    %c0_4 = arith.constant 0 : index
    %3 = vector.load %arg2[%c0_3, %c0_4] : memref<32x1xf32, #tpu.memory_space<vmem>>, vector<32x1xf32>
    %4 = vector.broadcast %3 : vector<32x1xf32> to vector<32x128xf32>
    %5 = arith.addf %2, %4 : vector<32x128xf32>
    %cst_5 = arith.constant 0.000000e+00 : f32
    %6 = vector.broadcast %cst_5 : f32 to vector<32x128xf32>
    %7 = arith.maximumf %5, %6 : vector<32x128xf32>
    %c0_6 = arith.constant 0 : index
    %c0_7 = arith.constant 0 : index
    %8 = vector.load %arg3[%c0_6, %c0_7] : memref<6x32xbf16, #tpu.memory_space<vmem>>, vector<6x32xbf16>
    %9 = arith.truncf %7 : vector<32x128xf32> to vector<32x128xbf16>
    %cst_8 = arith.constant dense<0.000000e+00> : vector<6x128xf32>
    %10 = tpu.matmul %8, %9, %cst_8 {dimension_numbers = #tpu.dot_dimension_numbers<[1], [0], [0], [1], [0, 0, 1, 1], [], []>} : vector<6x32xbf16>, vector<32x128xbf16>, vector<6x128xf32> -> vector<6x128xf32>
    %c0_9 = arith.constant 0 : index
    %c0_10 = arith.constant 0 : index
    %11 = vector.load %arg4[%c0_9, %c0_10] : memref<6x1xf32, #tpu.memory_space<vmem>>, vector<6x1xf32>
    %12 = vector.broadcast %11 : vector<6x1xf32> to vector<6x128xf32>
    %13 = arith.addf %10, %12 : vector<6x128xf32>
    %14 = arith.truncf %13 : vector<6x128xf32> to vector<6x128xbf16>
    %c0_11 = arith.constant 0 : index
    %c0_12 = arith.constant 0 : index
    %15 = vector.load %arg5[%c0_11, %c0_12] : memref<128x512xbf16, #tpu.memory_space<vmem>>, vector<128x512xbf16>
    %cst_13 = arith.constant dense<0.000000e+00> : vector<6x512xf32>
    %16 = tpu.matmul %14, %15, %cst_13 {dimension_numbers = #tpu.dot_dimension_numbers<[1], [0], [0], [1], [0, 0, 1, 1], [], []>} : vector<6x128xbf16>, vector<128x512xbf16>, vector<6x512xf32> -> vector<6x512xf32>
    %c0_14 = arith.constant 0 : index
    %c0_15 = arith.constant 0 : index
    %17 = vector.load %arg6[%c0_14, %c0_15] : memref<6x512xf32, #tpu.memory_space<vmem>>, vector<6x512xf32>
    tpu.vector_store %arg6[%c0_14, %c0_15], %16 {strides = array<i32>} : memref<6x512xf32, #tpu.memory_space<vmem>>, vector<6x512xf32>,
    return
  }
}

</mosaic_0001>

<bundles_post_ra>
// kernel: mul.4
= control target key start
LH: loop header
LB: loop body
LE: loop exit
PB: predicated region body
PF: predicated region fallthrough
CT: control target
= control target key end

     0   :  { %vm245_vm0 = vcmask 1043458   ;;  %s285_s6 = smov 3  ;;  %vm250_vm1 = vcmask 1045508   ;;  %vm255_vm2 = vcmask 1047558   ;;  %s288_s9 = smov 12  ;;  %vm4_vm3 = vcmask 1047556   ;;  %s6338_s0 = inlined_call_operand.vmem [shape: f32[16,16,8,8], index: 0, kind: input, shape index: {}]   ;;  %s6339_s1 = inlined_call_operand.vmem [shape: f32[256,64], index: 1, kind: output, shape index: {}]  }
   0x1   :  { %v2910_v0 = vld [vmem:[%s6338_s0 + $0x207] ss:$16 sm:%s285_s6]   ;;  %s293_s10 = smov 48  ;;  %s298_s15 = smov 192  ;;  %vm6_vm4 = vcmask 130048   ;;  %vm626_vm5 = vcmask 917248  }
   0x2   :  { %v2911_v1 = vld [vmem:[%s6338_s0 + $0x207] ss:$16 sm:%s288_s9]   ;;  %s240_s16 = smov 3  ;;  %s243_s21 = smov 12  ;;  %vm259_vm6 = vcmask 1048448   ;;  %vm993_vm7 = vcmask 786048  }
   0x3   :  { %v2912_v2 = vld [vmem:[%s6338_s0 + $0x207] ss:$16 sm:%s293_s10]   ;;  %v291_v3 = vsel %vm245_vm0, %v2911_v1, %v2910_v0  ;;  %s248_s22 = smov 48  ;;  %s253_s27 = smov 192  ;;  %vm1360_vm8 = vcmask 654848   ;;  %vm1727_vm9 = vcmask 523648  }
   0x4   :  { %v2913_v4 = vld [vmem:[%s6338_s0 + $0x207] ss:$16 sm:%s298_s15]   ;;  %v296_v6 = vsel %vm250_vm1, %v2912_v2, %v291_v3  ;;  %s308_s28 = smov 3  ;;  %s311_s4 = smov 12  ;;  %vm2094_vm10 = vcmask 392448   ;;  %vm2461_vm11 = vcmask 261248  }
   0x5   :  { %v2901_v5 = vld [vmem:[%s6338_s0 + $0x7] ss:$16 sm:%s240_s16]   ;;  %v301_v9 = vsel %vm255_vm2, %v2913_v4, %v296_v6  ;;  %s316_s5 = smov 48  ;;  %s3461_s6 = smov 112  }
   0x6   :  { %v2902_v7 = vld [vmem:[%s6338_s0 + $0x7] ss:$16 sm:%s243_s21]   ;;  %302 = vrot.lane.b32.xlu1 %v301_v9, %s3461_s6  ;;  %s321_s9 = smov 192  ;;  %s262_s10 = smov 3 }
   0x7   :  { %v2903_v8 = vld [vmem:[%s6338_s0 + $0x7] ss:$16 sm:%s248_s22]   ;;  %v246_v10 = vsel %vm245_vm0, %v2902_v7, %v2901_v5  ;;  %s265_s15 = smov 12  ;;  %s270_s16 = smov 48 }
   0x8   :  { %v2904_v11 = vld [vmem:[%s6338_s0 + $0x7] ss:$16 sm:%s253_s27]   ;;  %v251_v13 = vsel %vm250_vm1, %v2903_v8, %v246_v10  ;;  %s275_s19 = smov 192  ;;  %s354_s20 = smov 3 }
   0x9   :  { %v2915_v12 = vld [vmem:[%s6338_s0 + $0x307] ss:$16 sm:%s308_s28]   ;;  %v256_v15 = vsel %vm255_vm2, %v2904_v11, %v251_v13  ;;  %s357_s25 = smov 12  ;;  %s362_s26 = smov 48  ;;  %v2925_v27 = vld [vmem:[%s6338_s0 + $0x10f] ss:$16 sm:%s354_s20]  }
   0xa   :  { %v2916_v14 = vld [vmem:[%s6338_s0 + $0x307] ss:$16 sm:%s311_s4]   ;;  %257 = vrot.lane.b32.xlu0 %v256_v15, %s3461_s6  ;;  %s367_s29 = smov 192  ;;  %s331_s30 = smov 3 }
   0xb   :  { %v314_v16 = vsel %vm245_vm0, %v2916_v14, %v2915_v12  ;;  %v2917_v17 = vld [vmem:[%s6338_s0 + $0x307] ss:$16 sm:%s316_s5]   ;;  %v2926_v28 = vld [vmem:[%s6338_s0 + $0x10f] ss:$16 sm:%s357_s25]   ;;  %s334_s7 = smov 12  ;;  %s339_s8 = smov 48 }
   0xc   :  { %v2918_v18 = vld [vmem:[%s6338_s0 + $0x307] ss:$16 sm:%s321_s9]   ;;  %v319_v19 = vsel %vm250_vm1, %v2917_v17, %v314_v16  ;;  %v360_v30 = vsel %vm245_vm0, %v2926_v28, %v2925_v27  ;;  %v2927_v31 = vld [vmem:[%s6338_s0 + $0x10f] ss:$16 sm:%s362_s26]   ;;  %s344_s13 = smov 192  ;;  %s403_s17 = smov 12 }
   0xd   :  { %v2905_v20 = vld [vmem:[%s6338_s0 + $0x107] ss:$16 sm:%s262_s10]   ;;  %v324_v21 = vsel %vm255_vm2, %v2918_v18, %v319_v19  ;;  %v2928_v32 = vld [vmem:[%s6338_s0 + $0x10f] ss:$16 sm:%s367_s29]   ;;  %v365_v33 = vsel %vm250_vm1, %v2927_v31, %v360_v30  ;;  %s408_s22 = smov 48  ;;  %s413_s23 = smov 192 }
   0xe   :  { %v2906_v22 = vld [vmem:[%s6338_s0 + $0x107] ss:$16 sm:%s265_s15]   ;;  %325 = vrot.lane.b32.xlu1 %v324_v21, %s3461_s6  ;;  %v370_v35 = vsel %vm255_vm2, %v2928_v32, %v365_v33  ;;  %s377_s26 = smov 3  ;;  %s380_s2 = smov 12 }
   0xf   :  { %v2907_v23 = vld [vmem:[%s6338_s0 + $0x107] ss:$16 sm:%s270_s16]   ;;  %v268_v24 = vsel %vm245_vm0, %v2906_v22, %v2905_v20  ;;  %v2920_v34 = vld [vmem:[%s6338_s0 + $0xf] ss:$16 sm:%s331_s30]   ;;  %s400_s16 = smov 3  ;;  %s385_s3 = smov 48 }
  0x10   :  { %v2908_v25 = vld [vmem:[%s6338_s0 + $0x107] ss:$16 sm:%s275_s19]   ;;  %v273_v26 = vsel %vm250_vm1, %v2907_v23, %v268_v24  ;;  %v2921_v36 = vld [vmem:[%s6338_s0 + $0xf] ss:$16 sm:%s334_s7]   ;;  %s390_s9 = smov 192  ;;  %s446_s12 = smov 3 }
  0x11   :  { %v278_v29 = vsel %vm255_vm2, %v2908_v25, %v273_v26  ;;  %v2922_v37 = vld [vmem:[%s6338_s0 + $0xf] ss:$16 sm:%s339_s8]   ;;  %v337_v38 = vsel %vm245_vm0, %v2921_v36, %v2920_v34  ;;  %s454_s18 = smov 48  ;;  %s459_s19 = smov 192  ;;  %v2945_v55 = vld [vmem:[%s6338_s0 + $0x187] ss:$16 sm:%s446_s12]  }
  0x12   :  { %279 = vrot.lane.b32.xlu0 %v278_v29, %s3461_s6  ;;  %371 = vrot.lane.b32.xlu1 %v370_v35, %s3461_s6  ;;  %v2923_v39 = vld [vmem:[%s6338_s0 + $0xf] ss:$16 sm:%s344_s13]   ;;  %v342_v40 = vsel %vm250_vm1, %v2922_v37, %v337_v38  ;;  %s449_s13 = smov 12  ;;  %s426_s27 = smov 12 }
  0x13   :  { %v2935_v41 = vld [vmem:[%s6338_s0 + $0x30f] ss:$16 sm:%s400_s16]   ;;  %v347_v43 = vsel %vm255_vm2, %v2923_v39, %v342_v40  ;;  %v2946_v56 = vld [vmem:[%s6338_s0 + $0x187] ss:$16 sm:%s449_s13]   ;;  %s431_s28 = smov 48  ;;  %s436_s4 = smov 192 }
  0x14   :  { %v2936_v42 = vld [vmem:[%s6338_s0 + $0x30f] ss:$16 sm:%s403_s17]   ;;  %v452_v58 = vsel %vm245_vm0, %v2946_v56, %v2945_v55  ;;  %v2947_v59 = vld [vmem:[%s6338_s0 + $0x187] ss:$16 sm:%s454_s18]   ;;  %s492_s8 = smov 3  ;;  %s500_s14 = smov 48 }
  0x15   :  { %v406_v44 = vsel %vm245_vm0, %v2936_v42, %v2935_v41  ;;  %v2937_v45 = vld [vmem:[%s6338_s0 + $0x30f] ss:$16 sm:%s408_s22]   ;;  %s423_s22 = smov 3  ;;  %v2948_v60 = vld [vmem:[%s6338_s0 + $0x187] ss:$16 sm:%s459_s19]   ;;  %v457_v61 = vsel %vm250_vm1, %v2947_v59, %v452_v58  ;;  %s505_s15 = smov 192 }
  0x16   :  { %v2938_v46 = vld [vmem:[%s6338_s0 + $0x30f] ss:$16 sm:%s413_s23]   ;;  %348 = vrot.lane.b32.xlu0 %v347_v43, %s3461_s6  ;;  %v411_v47 = vsel %vm250_vm1, %v2937_v45, %v406_v44  ;;  %v462_v63 = vsel %vm255_vm2, %v2948_v60, %v457_v61  ;;  %s469_s18 = smov 3  ;;  %s472_s23 = smov 12 }
  0x17   :  { %v2930_v48 = vld [vmem:[%s6338_s0 + $0x20f] ss:$16 sm:%s377_s26]   ;;  %v416_v49 = vsel %vm255_vm2, %v2938_v46, %v411_v47  ;;  %v2940_v62 = vld [vmem:[%s6338_s0 + $0x87] ss:$16 sm:%s423_s22]   ;;  %s477_s24 = smov 48  ;;  %s482_s29 = smov 192 }
  0x18   :  { %v2931_v50 = vld [vmem:[%s6338_s0 + $0x20f] ss:$16 sm:%s380_s2]   ;;  %417 = vrot.lane.b32.xlu1 %v416_v49, %s3461_s6  ;;  %s546_s10 = smov 48  ;;  %s551_s11 = smov 192 }
  0x19   :  { %v2932_v51 = vld [vmem:[%s6338_s0 + $0x20f] ss:$16 sm:%s385_s3]   ;;  %v383_v52 = vsel %vm245_vm0, %v2931_v50, %v2930_v48  ;;  %v2941_v0 = vld [vmem:[%s6338_s0 + $0x87] ss:$16 sm:%s426_s27]   ;;  %s538_s3 = smov 3  ;;  %s518_s19 = smov 12 }
  0x1a   :  { %v2933_v53 = vld [vmem:[%s6338_s0 + $0x20f] ss:$16 sm:%s390_s9]   ;;  %v388_v54 = vsel %vm250_vm1, %v2932_v51, %v383_v52  ;;  %s495_s9 = smov 12  ;;  %v2942_v1 = vld [vmem:[%s6338_s0 + $0x87] ss:$16 sm:%s431_s28]   ;;  %v429_v2 = vsel %vm245_vm0, %v2941_v0, %v2940_v62  ;;  %s523_s20 = smov 48 }
  0x1b   :  { %v393_v57 = vsel %vm255_vm2, %v2933_v53, %v388_v54  ;;  %v2943_v3 = vld [vmem:[%s6338_s0 + $0x87] ss:$16 sm:%s436_s4]   ;;  %v434_v4 = vsel %vm250_vm1, %v2942_v1, %v429_v2  ;;  %s541_s4 = smov 12  ;;  %v2965_v19 = vld [vmem:[%s6338_s0 + $0x18f] ss:$16 sm:%s538_s3]   ;;  %s528_s25 = smov 192 }
  0x1c   :  { %394 = vrot.lane.b32.xlu0 %v393_v57, %s3461_s6  ;;  %463 = vrot.lane.b32.xlu1 %v462_v63, %s3461_s6  ;;  %v2955_v5 = vld [vmem:[%s6338_s0 + $0x387] ss:$16 sm:%s492_s8]   ;;  %v439_v7 = vsel %vm255_vm2, %v2943_v3, %v434_v4  ;;  %s584_s28 = smov 3  ;;  %s592_s5 = smov 48 }
  0x1d   :  { %v2956_v6 = vld [vmem:[%s6338_s0 + $0x387] ss:$16 sm:%s495_s9]   ;;  %v2966_v20 = vld [vmem:[%s6338_s0 + $0x18f] ss:$16 sm:%s541_s4]   ;;  %s597_s7 = smov 192  ;;  %s569_s16 = smov 48 }
  0x1e   :  { %v498_v8 = vsel %vm245_vm0, %v2956_v6, %v2955_v5  ;;  %v2957_v9 = vld [vmem:[%s6338_s0 + $0x387] ss:$16 sm:%s500_s14]   ;;  %s515_s14 = smov 3  ;;  %v544_v22 = vsel %vm245_vm0, %v2966_v20, %v2965_v19  ;;  %v2967_v23 = vld [vmem:[%s6338_s0 + $0x18f] ss:$16 sm:%s546_s10]   ;;  %s561_s10 = smov 3 }
  0x1f   :  { %v2958_v10 = vld [vmem:[%s6338_s0 + $0x387] ss:$16 sm:%s505_s15]   ;;  %v503_v11 = vsel %vm250_vm1, %v2957_v9, %v498_v8  ;;  %v2968_v24 = vld [vmem:[%s6338_s0 + $0x18f] ss:$16 sm:%s551_s11]   ;;  %v549_v25 = vsel %vm250_vm1, %v2967_v23, %v544_v22  ;;  %s564_s15 = smov 12  ;;  %s574_s21 = smov 192 }
  0x20   :  { %440 = vrot.lane.b32.xlu0 %v439_v7, %s3461_s6  ;;  %v2950_v12 = vld [vmem:[%s6338_s0 + $0x287] ss:$16 sm:%s469_s18]   ;;  %v508_v13 = vsel %vm255_vm2, %v2958_v10, %v503_v11  ;;  %v554_v27 = vsel %vm255_vm2, %v2968_v24, %v549_v25  ;;  %s637_s30 = smov 48  ;;  %s642_s2 = smov 192 }
  0x21   :  { %v2951_v14 = vld [vmem:[%s6338_s0 + $0x287] ss:$16 sm:%s472_s23]   ;;  %509 = vrot.lane.b32.xlu1 %v508_v13, %s3461_s6  ;;  %s610_s11 = smov 12  ;;  %s615_s12 = smov 48 }
  0x22   :  { %v2952_v15 = vld [vmem:[%s6338_s0 + $0x287] ss:$16 sm:%s477_s24]   ;;  %v475_v16 = vsel %vm245_vm0, %v2951_v14, %v2950_v12  ;;  %v2960_v26 = vld [vmem:[%s6338_s0 + $0x8f] ss:$16 sm:%s515_s14]   ;;  %s629_s24 = smov 3  ;;  %s620_s17 = smov 192 }
  0x23   :  { %v2953_v17 = vld [vmem:[%s6338_s0 + $0x287] ss:$16 sm:%s482_s29]   ;;  %v480_v18 = vsel %vm250_vm1, %v2952_v15, %v475_v16  ;;  %s587_s29 = smov 12  ;;  %v2961_v28 = vld [vmem:[%s6338_s0 + $0x8f] ss:$16 sm:%s518_s19]   ;;  %s675_s19 = smov 3 }
  0x24   :  { %v485_v21 = vsel %vm255_vm2, %v2953_v17, %v480_v18  ;;  %v2962_v29 = vld [vmem:[%s6338_s0 + $0x8f] ss:$16 sm:%s523_s20]   ;;  %v521_v30 = vsel %vm245_vm0, %v2961_v28, %v2960_v26  ;;  %v2984_v47 = vld [vmem:[%s6338_s0 + $0x106] ss:$16 sm:%s629_s24]   ;;  %s678_s20 = smov 12  ;;  %s688_s26 = smov 192 }
  0x25   :  { %486 = vrot.lane.b32.xlu0 %v485_v21, %s3461_s6  ;;  %555 = vrot.lane.b32.xlu1 %v554_v27, %s3461_s6  ;;  %v2963_v31 = vld [vmem:[%s6338_s0 + $0x8f] ss:$16 sm:%s528_s25]   ;;  %v526_v32 = vsel %vm250_vm1, %v2962_v29, %v521_v30  ;;  %s632_s25 = smov 12  ;;  %s3462_s27 = smov 96  }
  0x26   :  { %v2975_v33 = vld [vmem:[%s6338_s0 + $0x38f] ss:$16 sm:%s584_s28]   ;;  %v531_v35 = vsel %vm255_vm2, %v2963_v31, %v526_v32  ;;  %v2985_v48 = vld [vmem:[%s6338_s0 + $0x106] ss:$16 sm:%s632_s25]   ;;  %s683_s25 = smov 48  ;;  %s660_s8 = smov 48 }
  0x27   :  { %v2976_v34 = vld [vmem:[%s6338_s0 + $0x38f] ss:$16 sm:%s587_s29]   ;;  %v635_v50 = vsel %vm245_vm0, %v2985_v48, %v2984_v47  ;;  %v2986_v51 = vld [vmem:[%s6338_s0 + $0x106] ss:$16 sm:%s637_s30]   ;;  %s652_s30 = smov 3  ;;  %s665_s13 = smov 192 }
  0x28   :  { %v590_v36 = vsel %vm245_vm0, %v2976_v34, %v2975_v33  ;;  %v2977_v37 = vld [vmem:[%s6338_s0 + $0x38f] ss:$16 sm:%s592_s5]   ;;  %s607_s5 = smov 3  ;;  %v2987_v52 = vld [vmem:[%s6338_s0 + $0x106] ss:$16 sm:%s642_s2]   ;;  %v640_v53 = vsel %vm250_vm1, %v2986_v51, %v635_v50  ;;  %s734_s22 = smov 192 }
  0x29   :  { %v2978_v38 = vld [vmem:[%s6338_s0 + $0x38f] ss:$16 sm:%s597_s7]   ;;  %532 = vrot.lane.b32.xlu0 %v531_v35, %s3461_s6  ;;  %v595_v39 = vsel %vm250_vm1, %v2977_v37, %v590_v36  ;;  %v645_v55 = vsel %vm255_vm2, %v2987_v52, %v640_v53  ;;  %s655_s7 = smov 12  ;;  %s701_s2 = smov 12 }
  0x2a   :  { %v2970_v40 = vld [vmem:[%s6338_s0 + $0x28f] ss:$16 sm:%s561_s10]   ;;  %v600_v41 = vsel %vm255_vm2, %v2978_v38, %v595_v39  ;;  %v2980_v54 = vld [vmem:[%s6338_s0 + $0x6] ss:$16 sm:%s607_s5]   ;;  %s706_s3 = smov 48  ;;  %s711_s9 = smov 192 }
  0x2b   :  { %v2971_v42 = vld [vmem:[%s6338_s0 + $0x28f] ss:$16 sm:%s564_s15]   ;;  %601 = vrot.lane.b32.xlu1 %v600_v41, %s3461_s6  ;;  %s780_s18 = smov 192  ;;  %s752_s28 = smov 48 }
  0x2c   :  { %v2972_v43 = vld [vmem:[%s6338_s0 + $0x28f] ss:$16 sm:%s569_s16]   ;;  %v567_v44 = vsel %vm245_vm0, %v2971_v42, %v2970_v40  ;;  %v2981_v56 = vld [vmem:[%s6338_s0 + $0x6] ss:$16 sm:%s610_s11]   ;;  %s721_s16 = smov 3  ;;  %s757_s4 = smov 192 }
  0x2d   :  { %v2973_v45 = vld [vmem:[%s6338_s0 + $0x28f] ss:$16 sm:%s574_s21]   ;;  %v572_v46 = vsel %vm250_vm1, %v2972_v43, %v567_v44  ;;  %v2982_v57 = vld [vmem:[%s6338_s0 + $0x6] ss:$16 sm:%s615_s12]   ;;  %v613_v58 = vsel %vm245_vm0, %v2981_v56, %v2980_v54  ;;  %s729_s21 = smov 48  ;;  %s767_s12 = smov 3 }
  0x2e   :  { %v577_v49 = vsel %vm255_vm2, %v2973_v45, %v572_v46  ;;  %v2983_v59 = vld [vmem:[%s6338_s0 + $0x6] ss:$16 sm:%s620_s17]   ;;  %v618_v60 = vsel %vm250_vm1, %v2982_v57, %v613_v58  ;;  %s724_s17 = smov 12  ;;  %v3004_v11 = vld [vmem:[%s6338_s0 + $0x10e] ss:$16 sm:%s721_s16]   ;;  %s821_s14 = smov 48 }
  0x2f   :  { %578 = vrot.lane.b32.xlu0 %v577_v49, %s3461_s6  ;;  %646 = vrot.lane.b32.xlu1 %v645_v55, %s3462_s27  ;;  %v2994_v61 = vld [vmem:[%s6338_s0 + $0x306] ss:$16 sm:%s675_s19]   ;;  %v623_v63 = vsel %vm255_vm2, %v2983_v59, %v618_v60  ;;  %s775_s6 = smov 48  ;;  %s826_s15 = smov 192 }
  0x30   :  { %v2995_v62 = vld [vmem:[%s6338_s0 + $0x306] ss:$16 sm:%s678_s20]   ;;  %v3005_v12 = vld [vmem:[%s6338_s0 + $0x10e] ss:$16 sm:%s724_s17]   ;;  %s798_s23 = smov 48  ;;  %s803_s29 = smov 192 }
  0x31   :  { %v681_v0 = vsel %vm245_vm0, %v2995_v62, %v2994_v61  ;;  %v2996_v1 = vld [vmem:[%s6338_s0 + $0x306] ss:$16 sm:%s683_s25]   ;;  %s698_s25 = smov 3  ;;  %v727_v14 = vsel %vm245_vm0, %v3005_v12, %v3004_v11  ;;  %v3006_v15 = vld [vmem:[%s6338_s0 + $0x10e] ss:$16 sm:%s729_s21]   ;;  %s744_s21 = smov 3 }
  0x32   :  { %v2997_v2 = vld [vmem:[%s6338_s0 + $0x306] ss:$16 sm:%s688_s26]   ;;  %v686_v3 = vsel %vm250_vm1, %v2996_v1, %v681_v0  ;;  %v3007_v16 = vld [vmem:[%s6338_s0 + $0x10e] ss:$16 sm:%s734_s22]   ;;  %v732_v17 = vsel %vm250_vm1, %v3006_v15, %v727_v14  ;;  %s747_s26 = smov 12  ;;  %s793_s22 = smov 12 }
  0x33   :  { %624 = vrot.lane.b32.xlu0 %v623_v63, %s3462_s27  ;;  %v2989_v4 = vld [vmem:[%s6338_s0 + $0x206] ss:$16 sm:%s652_s30]   ;;  %v691_v5 = vsel %vm255_vm2, %v2997_v2, %v686_v3  ;;  %v737_v19 = vsel %vm255_vm2, %v3007_v16, %v732_v17  ;;  %s867_s10 = smov 48  ;;  %s872_s11 = smov 192 }
  0x34   :  { %v2990_v6 = vld [vmem:[%s6338_s0 + $0x206] ss:$16 sm:%s655_s7]   ;;  %692 = vrot.lane.b32.xlu1 %v691_v5, %s3462_s27  ;;  %s844_s19 = smov 48  ;;  %s849_s24 = smov 192 }
  0x35   :  { %v2991_v7 = vld [vmem:[%s6338_s0 + $0x206] ss:$16 sm:%s660_s8]   ;;  %v658_v8 = vsel %vm245_vm0, %v2990_v6, %v2989_v4  ;;  %v2999_v18 = vld [vmem:[%s6338_s0 + $0xe] ss:$16 sm:%s698_s25]   ;;  %s813_s8 = smov 3  ;;  %s913_s5 = smov 48 }
  0x36   :  { %v2992_v9 = vld [vmem:[%s6338_s0 + $0x206] ss:$16 sm:%s665_s13]   ;;  %v663_v10 = vsel %vm250_vm1, %v2991_v7, %v658_v8  ;;  %s770_s13 = smov 12  ;;  %v3000_v20 = vld [vmem:[%s6338_s0 + $0xe] ss:$16 sm:%s701_s2]   ;;  %s918_s7 = smov 192 }
  0x37   :  { %v668_v13 = vsel %vm255_vm2, %v2992_v9, %v663_v10  ;;  %v3001_v21 = vld [vmem:[%s6338_s0 + $0xe] ss:$16 sm:%s706_s3]   ;;  %v704_v22 = vsel %vm245_vm0, %v3000_v20, %v2999_v18  ;;  %v3024_v39 = vld [vmem:[%s6338_s0 + $0x186] ss:$16 sm:%s813_s8]   ;;  %s859_s3 = smov 3  ;;  %s890_s16 = smov 48 }
  0x38   :  { %669 = vrot.lane.b32.xlu0 %v668_v13, %s3462_s27  ;;  %738 = vrot.lane.b32.xlu1 %v737_v19, %s3462_s27  ;;  %v3002_v23 = vld [vmem:[%s6338_s0 + $0xe] ss:$16 sm:%s711_s9]   ;;  %v709_v24 = vsel %vm250_vm1, %v3001_v21, %v704_v22  ;;  %s816_s9 = smov 12  ;;  %s895_s20 = smov 192 }
  0x39   :  { %v3014_v25 = vld [vmem:[%s6338_s0 + $0x30e] ss:$16 sm:%s767_s12]   ;;  %v714_v27 = vsel %vm255_vm2, %v3002_v23, %v709_v24  ;;  %v3025_v40 = vld [vmem:[%s6338_s0 + $0x186] ss:$16 sm:%s816_s9]   ;;  %s959_s30 = smov 48  ;;  %s964_s2 = smov 192 }
  0x3a   :  { %v3015_v26 = vld [vmem:[%s6338_s0 + $0x30e] ss:$16 sm:%s770_s13]   ;;  %v819_v42 = vsel %vm245_vm0, %v3025_v40, %v3024_v39  ;;  %v3026_v43 = vld [vmem:[%s6338_s0 + $0x186] ss:$16 sm:%s821_s14]   ;;  %s836_s14 = smov 3  ;;  %s936_s12 = smov 48 }
  0x3b   :  { %v773_v28 = vsel %vm245_vm0, %v3015_v26, %v3014_v25  ;;  %v3016_v29 = vld [vmem:[%s6338_s0 + $0x30e] ss:$16 sm:%s775_s6]   ;;  %s790_s6 = smov 3  ;;  %v3027_v44 = vld [vmem:[%s6338_s0 + $0x186] ss:$16 sm:%s826_s15]   ;;  %v824_v45 = vsel %vm250_vm1, %v3026_v43, %v819_v42  ;;  %s885_s15 = smov 12 }
  0x3c   :  { %v3017_v30 = vld [vmem:[%s6338_s0 + $0x30e] ss:$16 sm:%s780_s18]   ;;  %715 = vrot.lane.b32.xlu0 %v714_v27, %s3462_s27  ;;  %v778_v31 = vsel %vm250_vm1, %v3016_v29, %v773_v28  ;;  %v829_v47 = vsel %vm255_vm2, %v3027_v44, %v824_v45  ;;  %s839_s18 = smov 12  ;;  %s941_s17 = smov 192 }
  0x3d   :  { %v3009_v32 = vld [vmem:[%s6338_s0 + $0x20e] ss:$16 sm:%s744_s21]   ;;  %v783_v33 = vsel %vm255_vm2, %v3017_v30, %v778_v31  ;;  %v3019_v46 = vld [vmem:[%s6338_s0 + $0x86] ss:$16 sm:%s790_s6]   ;;  %s1004_s25 = smov 48  ;;  %s982_s8 = smov 48 }
  0x3e   :  { %v3010_v34 = vld [vmem:[%s6338_s0 + $0x20e] ss:$16 sm:%s747_s26]   ;;  %784 = vrot.lane.b32.xlu1 %v783_v33, %s3462_s27  ;;  %s1009_s26 = smov 192  ;;  %s987_s13 = smov 192 }
  0x3f   :  { %v3011_v35 = vld [vmem:[%s6338_s0 + $0x20e] ss:$16 sm:%s752_s28]   ;;  %v750_v36 = vsel %vm245_vm0, %v3010_v34, %v3009_v32  ;;  %v3020_v48 = vld [vmem:[%s6338_s0 + $0x86] ss:$16 sm:%s793_s22]   ;;  %s905_s28 = smov 3  ;;  %s1055_s21 = smov 192 }
  0x40   :  { %v3012_v37 = vld [vmem:[%s6338_s0 + $0x20e] ss:$16 sm:%s757_s4]   ;;  %v755_v38 = vsel %vm250_vm1, %v3011_v35, %v750_v36  ;;  %s862_s4 = smov 12  ;;  %v3021_v49 = vld [vmem:[%s6338_s0 + $0x86] ss:$16 sm:%s798_s23]   ;;  %v796_v50 = vsel %vm245_vm0, %v3020_v48, %v3019_v46  ;;  %s951_s23 = smov 3 }
  0x41   :  { %v760_v41 = vsel %vm255_vm2, %v3012_v37, %v755_v38  ;;  %v3022_v51 = vld [vmem:[%s6338_s0 + $0x86] ss:$16 sm:%s803_s29]   ;;  %v801_v52 = vsel %vm250_vm1, %v3021_v49, %v796_v50  ;;  %s908_s29 = smov 12  ;;  %v3044_v3 = vld [vmem:[%s6338_s0 + $0x18e] ss:$16 sm:%s905_s28]   ;;  %s3463_s22 = smov 80  }
  0x42   :  { %761 = vrot.lane.b32.xlu0 %v760_v41, %s3462_s27  ;;  %830 = vrot.lane.b32.xlu1 %v829_v47, %s3462_s27  ;;  %v3034_v53 = vld [vmem:[%s6338_s0 + $0x386] ss:$16 sm:%s859_s3]   ;;  %v806_v55 = vsel %vm255_vm2, %v3022_v51, %v801_v52  ;;  %s1027_s3 = smov 48  ;;  %s1032_s9 = smov 192 }
  0x43   :  { %v3035_v54 = vld [vmem:[%s6338_s0 + $0x386] ss:$16 sm:%s862_s4]   ;;  %v3045_v4 = vld [vmem:[%s6338_s0 + $0x18e] ss:$16 sm:%s908_s29]   ;;  %s1101_s6 = smov 192  ;;  %s1073_s28 = smov 48 }
  0x44   :  { %v865_v56 = vsel %vm245_vm0, %v3035_v54, %v3034_v53  ;;  %v3036_v57 = vld [vmem:[%s6338_s0 + $0x386] ss:$16 sm:%s867_s10]   ;;  %s882_s10 = smov 3  ;;  %v911_v6 = vsel %vm245_vm0, %v3045_v4, %v3044_v3  ;;  %v3046_v7 = vld [vmem:[%s6338_s0 + $0x18e] ss:$16 sm:%s913_s5]   ;;  %s928_s5 = smov 3 }
  0x45   :  { %v3037_v58 = vld [vmem:[%s6338_s0 + $0x386] ss:$16 sm:%s872_s11]   ;;  %v870_v59 = vsel %vm250_vm1, %v3036_v57, %v865_v56  ;;  %v3047_v8 = vld [vmem:[%s6338_s0 + $0x18e] ss:$16 sm:%s918_s7]   ;;  %v916_v9 = vsel %vm250_vm1, %v3046_v7, %v911_v6  ;;  %s931_s11 = smov 12  ;;  %s977_s7 = smov 12 }
  0x46   :  { %807 = vrot.lane.b32.xlu0 %v806_v55, %s3462_s27  ;;  %v3029_v60 = vld [vmem:[%s6338_s0 + $0x286] ss:$16 sm:%s836_s14]   ;;  %v875_v61 = vsel %vm255_vm2, %v3037_v58, %v870_v59  ;;  %v921_v11 = vsel %vm255_vm2, %v3047_v8, %v916_v9  ;;  %s1078_s4 = smov 192  ;;  %s1147_s14 = smov 192 }
  0x47   :  { %v3030_v62 = vld [vmem:[%s6338_s0 + $0x286] ss:$16 sm:%s839_s18]   ;;  %876 = vrot.lane.b32.xlu1 %v875_v61, %s3462_s27  ;;  %s1124_s29 = smov 192  ;;  %s1165_s18 = smov 48 }
  0x48   :  { %v3031_v63 = vld [vmem:[%s6338_s0 + $0x286] ss:$16 sm:%s844_s19]   ;;  %v842_v0 = vsel %vm245_vm0, %v3030_v62, %v3029_v60  ;;  %v3039_v10 = vld [vmem:[%s6338_s0 + $0x8e] ss:$16 sm:%s882_s10]   ;;  %s996_s19 = smov 3  ;;  %s1188_s10 = smov 48 }
  0x49   :  { %v3032_v1 = vld [vmem:[%s6338_s0 + $0x286] ss:$16 sm:%s849_s24]   ;;  %v847_v2 = vsel %vm250_vm1, %v3031_v63, %v842_v0  ;;  %s954_s24 = smov 12  ;;  %v3040_v12 = vld [vmem:[%s6338_s0 + $0x8e] ss:$16 sm:%s885_s15]   ;;  %s1042_s15 = smov 3 }
  0x4a   :  { %v852_v5 = vsel %vm255_vm2, %v3032_v1, %v847_v2  ;;  %v3041_v13 = vld [vmem:[%s6338_s0 + $0x8e] ss:$16 sm:%s890_s16]   ;;  %v888_v14 = vsel %vm245_vm0, %v3040_v12, %v3039_v10  ;;  %v3063_v31 = vld [vmem:[%s6338_s0 + $0x105] ss:$16 sm:%s996_s19]   ;;  %s1045_s16 = smov 12  ;;  %s1216_s19 = smov 192 }
  0x4b   :  { %853 = vrot.lane.b32.xlu0 %v852_v5, %s3462_s27  ;;  %922 = vrot.lane.b32.xlu1 %v921_v11, %s3462_s27  ;;  %v3042_v15 = vld [vmem:[%s6338_s0 + $0x8e] ss:$16 sm:%s895_s20]   ;;  %v893_v16 = vsel %vm250_vm1, %v3041_v13, %v888_v14  ;;  %s999_s20 = smov 12 }
  0x4c   :  { %v3054_v17 = vld [vmem:[%s6338_s0 + $0x38e] ss:$16 sm:%s951_s23]   ;;  %v898_v19 = vsel %vm255_vm2, %v3042_v15, %v893_v16  ;;  %v3064_v32 = vld [vmem:[%s6338_s0 + $0x105] ss:$16 sm:%s999_s20]   ;;  %s1050_s20 = smov 48  ;;  %s1119_s23 = smov 48 }
  0x4d   :  { %v3055_v18 = vld [vmem:[%s6338_s0 + $0x38e] ss:$16 sm:%s954_s24]   ;;  %v1002_v34 = vsel %vm245_vm0, %v3064_v32, %v3063_v31  ;;  %v3065_v35 = vld [vmem:[%s6338_s0 + $0x105] ss:$16 sm:%s1004_s25]   ;;  %s1019_s25 = smov 3  ;;  %s1170_s24 = smov 192 }
  0x4e   :  { %v957_v20 = vsel %vm245_vm0, %v3055_v18, %v3054_v17  ;;  %v3056_v21 = vld [vmem:[%s6338_s0 + $0x38e] ss:$16 sm:%s959_s30]   ;;  %s974_s30 = smov 3  ;;  %v3066_v36 = vld [vmem:[%s6338_s0 + $0x105] ss:$16 sm:%s1009_s26]   ;;  %v1007_v37 = vsel %vm250_vm1, %v3065_v35, %v1002_v34  ;;  %s1068_s26 = smov 12 }
  0x4f   :  { %v3057_v22 = vld [vmem:[%s6338_s0 + $0x38e] ss:$16 sm:%s964_s2]   ;;  %899 = vrot.lane.b32.xlu0 %v898_v19, %s3462_s27  ;;  %v962_v23 = vsel %vm250_vm1, %v3056_v21, %v957_v20  ;;  %v1012_v39 = vsel %vm255_vm2, %v3066_v36, %v1007_v37  ;;  %s1022_s2 = smov 12 }
  0x50   :  { %v3049_v24 = vld [vmem:[%s6338_s0 + $0x28e] ss:$16 sm:%s928_s5]   ;;  %v967_v25 = vsel %vm255_vm2, %v3057_v22, %v962_v23  ;;  %v3059_v38 = vld [vmem:[%s6338_s0 + $0x5] ss:$16 sm:%s974_s30]   ;;  %s1234_s5 = smov 48  ;;  %s1280_s30 = smov 48 }
  0x51   :  { %v3050_v26 = vld [vmem:[%s6338_s0 + $0x28e] ss:$16 sm:%s931_s11]   ;;  %968 = vrot.lane.b32.xlu1 %v967_v25, %s3462_s27  ;;  %s1193_s11 = smov 192 }
  0x52   :  { %v3051_v27 = vld [vmem:[%s6338_s0 + $0x28e] ss:$16 sm:%s936_s12]   ;;  %v934_v28 = vsel %vm245_vm0, %v3050_v26, %v3049_v24  ;;  %v3060_v40 = vld [vmem:[%s6338_s0 + $0x5] ss:$16 sm:%s977_s7]   ;;  %s1088_s12 = smov 3  ;;  %s1239_s7 = smov 192 }
  0x53   :  { %v3052_v29 = vld [vmem:[%s6338_s0 + $0x28e] ss:$16 sm:%s941_s17]   ;;  %v939_v30 = vsel %vm250_vm1, %v3051_v27, %v934_v28  ;;  %v3061_v41 = vld [vmem:[%s6338_s0 + $0x5] ss:$16 sm:%s982_s8]   ;;  %v980_v42 = vsel %vm245_vm0, %v3060_v40, %v3059_v38  ;;  %s1096_s17 = smov 48  ;;  %s1134_s8 = smov 3 }
  0x54   :  { %v944_v33 = vsel %vm255_vm2, %v3052_v29, %v939_v30  ;;  %v3062_v43 = vld [vmem:[%s6338_s0 + $0x5] ss:$16 sm:%s987_s13]   ;;  %v985_v44 = vsel %vm250_vm1, %v3061_v41, %v980_v42  ;;  %s1091_s13 = smov 12  ;;  %v3083_v59 = vld [vmem:[%s6338_s0 + $0x10d] ss:$16 sm:%s1088_s12]   ;;  %s1257_s12 = smov 48 }
  0x55   :  { %945 = vrot.lane.b32.xlu0 %v944_v33, %s3462_s27  ;;  %1013 = vrot.lane.b32.xlu1 %v1012_v39, %s3463_s22  ;;  %v3073_v45 = vld [vmem:[%s6338_s0 + $0x305] ss:$16 sm:%s1042_s15]   ;;  %v990_v47 = vsel %vm255_vm2, %v3062_v43, %v985_v44  ;;  %s1142_s27 = smov 48  ;;  %s1211_s15 = smov 48 }
  0x56   :  { %v3074_v46 = vld [vmem:[%s6338_s0 + $0x305] ss:$16 sm:%s1045_s16]   ;;  %v3084_v60 = vld [vmem:[%s6338_s0 + $0x10d] ss:$16 sm:%s1091_s13]   ;;  %s1262_s16 = smov 192  ;;  %s1308_s13 = smov 192 }
  0x57   :  { %v1048_v48 = vsel %vm245_vm0, %v3074_v46, %v3073_v45  ;;  %v3075_v49 = vld [vmem:[%s6338_s0 + $0x305] ss:$16 sm:%s1050_s20]   ;;  %s1065_s20 = smov 3  ;;  %v1094_v62 = vsel %vm245_vm0, %v3084_v60, %v3083_v59  ;;  %v3085_v63 = vld [vmem:[%s6338_s0 + $0x10d] ss:$16 sm:%s1096_s17]   ;;  %s1111_s17 = smov 3 }
  0x58   :  { %v3076_v50 = vld [vmem:[%s6338_s0 + $0x305] ss:$16 sm:%s1055_s21]   ;;  %v1053_v51 = vsel %vm250_vm1, %v3075_v49, %v1048_v48  ;;  %v3086_v0 = vld [vmem:[%s6338_s0 + $0x10d] ss:$16 sm:%s1101_s6]   ;;  %v1099_v1 = vsel %vm250_vm1, %v3085_v63, %v1094_v62  ;;  %s1114_s21 = smov 12  ;;  %s1160_s6 = smov 12 }
  0x59   :  { %991 = vrot.lane.b32.xlu0 %v990_v47, %s3463_s22  ;;  %v3068_v52 = vld [vmem:[%s6338_s0 + $0x205] ss:$16 sm:%s1019_s25]   ;;  %v1058_v53 = vsel %vm255_vm2, %v3076_v50, %v1053_v51  ;;  %v1104_v3 = vsel %vm255_vm2, %v3086_v0, %v1099_v1  ;;  %s1326_s25 = smov 48 }
  0x5a   :  { %v3069_v54 = vld [vmem:[%s6338_s0 + $0x205] ss:$16 sm:%s1022_s2]   ;;  %1059 = vrot.lane.b32.xlu1 %v1058_v53, %s3463_s22  ;;  %s1285_s2 = smov 192 }
  0x5b   :  { %v3070_v55 = vld [vmem:[%s6338_s0 + $0x205] ss:$16 sm:%s1027_s3]   ;;  %v1025_v56 = vsel %vm245_vm0, %v3069_v54, %v3068_v52  ;;  %v3078_v2 = vld [vmem:[%s6338_s0 + $0xd] ss:$16 sm:%s1065_s20]   ;;  %s1180_s3 = smov 3  ;;  %s1371_s20 = smov 48 }
  0x5c   :  { %v3071_v57 = vld [vmem:[%s6338_s0 + $0x205] ss:$16 sm:%s1032_s9]   ;;  %v1030_v58 = vsel %vm250_vm1, %v3070_v55, %v1025_v56  ;;  %s1137_s9 = smov 12  ;;  %v3079_v4 = vld [vmem:[%s6338_s0 + $0xd] ss:$16 sm:%s1068_s26]   ;;  %s1331_s26 = smov 192 }
  0x5d   :  { %v1035_v61 = vsel %vm255_vm2, %v3071_v57, %v1030_v58  ;;  %v3080_v5 = vld [vmem:[%s6338_s0 + $0xd] ss:$16 sm:%s1073_s28]   ;;  %v1071_v6 = vsel %vm245_vm0, %v3079_v4, %v3078_v2  ;;  %v3103_v23 = vld [vmem:[%s6338_s0 + $0x185] ss:$16 sm:%s1180_s3]   ;;  %s1226_s28 = smov 3  ;;  %s1349_s3 = smov 48 }
  0x5e   :  { %1036 = vrot.lane.b32.xlu0 %v1035_v61, %s3463_s22  ;;  %1105 = vrot.lane.b32.xlu1 %v1104_v3, %s3463_s22  ;;  %v3081_v7 = vld [vmem:[%s6338_s0 + $0xd] ss:$16 sm:%s1078_s4]   ;;  %v1076_v8 = vsel %vm250_vm1, %v3080_v5, %v1071_v6  ;;  %s1183_s4 = smov 12 }
  0x5f   :  { %v3093_v9 = vld [vmem:[%s6338_s0 + $0x30d] ss:$16 sm:%s1134_s8]   ;;  %v1081_v11 = vsel %vm255_vm2, %v3081_v7, %v1076_v8  ;;  %v3104_v24 = vld [vmem:[%s6338_s0 + $0x185] ss:$16 sm:%s1183_s4]   ;;  %s1303_s8 = smov 48  ;;  %s1399_s4 = smov 192 }
  0x60   :  { %v3094_v10 = vld [vmem:[%s6338_s0 + $0x30d] ss:$16 sm:%s1137_s9]   ;;  %v1186_v26 = vsel %vm245_vm0, %v3104_v24, %v3103_v23  ;;  %v3105_v27 = vld [vmem:[%s6338_s0 + $0x185] ss:$16 sm:%s1188_s10]   ;;  %s1203_s10 = smov 3  ;;  %s1354_s9 = smov 192 }
  0x61   :  { %v1140_v12 = vsel %vm245_vm0, %v3094_v10, %v3093_v9  ;;  %v3095_v13 = vld [vmem:[%s6338_s0 + $0x30d] ss:$16 sm:%s1142_s27]   ;;  %s1157_s27 = smov 3  ;;  %v3106_v28 = vld [vmem:[%s6338_s0 + $0x185] ss:$16 sm:%s1193_s11]   ;;  %v1191_v29 = vsel %vm250_vm1, %v3105_v27, %v1186_v26  ;;  %s1252_s11 = smov 12 }
  0x62   :  { %v3096_v14 = vld [vmem:[%s6338_s0 + $0x30d] ss:$16 sm:%s1147_s14]   ;;  %1082 = vrot.lane.b32.xlu0 %v1081_v11, %s3463_s22  ;;  %v1145_v15 = vsel %vm250_vm1, %v3095_v13, %v1140_v12  ;;  %v1196_v31 = vsel %vm255_vm2, %v3106_v28, %v1191_v29  ;;  %s1206_s14 = smov 12 }
  0x63   :  { %v3088_v16 = vld [vmem:[%s6338_s0 + $0x20d] ss:$16 sm:%s1111_s17]   ;;  %v1150_v17 = vsel %vm255_vm2, %v3096_v14, %v1145_v15  ;;  %v3098_v30 = vld [vmem:[%s6338_s0 + $0x85] ss:$16 sm:%s1157_s27]   ;;  %s1422_s17 = smov 192  ;;  %s1468_s27 = smov 192 }
  0x64   :  { %v3089_v18 = vld [vmem:[%s6338_s0 + $0x20d] ss:$16 sm:%s1114_s21]   ;;  %1151 = vrot.lane.b32.xlu1 %v1150_v17, %s3463_s22  ;;  %s1376_s21 = smov 192 }
  0x65   :  { %v3090_v19 = vld [vmem:[%s6338_s0 + $0x20d] ss:$16 sm:%s1119_s23]   ;;  %v1117_v20 = vsel %vm245_vm0, %v3089_v18, %v3088_v16  ;;  %v3099_v32 = vld [vmem:[%s6338_s0 + $0x85] ss:$16 sm:%s1160_s6]   ;;  %s1272_s23 = smov 3  ;;  %s3464_s6 = smov 64  }
  0x66   :  { %v3091_v21 = vld [vmem:[%s6338_s0 + $0x20d] ss:$16 sm:%s1124_s29]   ;;  %v1122_v22 = vsel %vm250_vm1, %v3090_v19, %v1117_v20  ;;  %s1229_s29 = smov 12  ;;  %v3100_v33 = vld [vmem:[%s6338_s0 + $0x85] ss:$16 sm:%s1165_s18]   ;;  %v1163_v34 = vsel %vm245_vm0, %v3099_v32, %v3098_v30  ;;  %s1318_s18 = smov 3 }
  0x67   :  { %v1127_v25 = vsel %vm255_vm2, %v3091_v21, %v1122_v22  ;;  %v3101_v35 = vld [vmem:[%s6338_s0 + $0x85] ss:$16 sm:%s1170_s24]   ;;  %v1168_v36 = vsel %vm250_vm1, %v3100_v33, %v1163_v34  ;;  %s1275_s24 = smov 12  ;;  %v3123_v51 = vld [vmem:[%s6338_s0 + $0x18d] ss:$16 sm:%s1272_s23]   ;;  %s1440_s23 = smov 48 }
  0x68   :  { %1128 = vrot.lane.b32.xlu0 %v1127_v25, %s3463_s22  ;;  %1197 = vrot.lane.b32.xlu1 %v1196_v31, %s3463_s22  ;;  %v3113_v37 = vld [vmem:[%s6338_s0 + $0x385] ss:$16 sm:%s1226_s28]   ;;  %v1173_v39 = vsel %vm255_vm2, %v3101_v35, %v1168_v36  ;;  %s1394_s28 = smov 48 }
  0x69   :  { %v3114_v38 = vld [vmem:[%s6338_s0 + $0x385] ss:$16 sm:%s1229_s29]   ;;  %v3124_v52 = vld [vmem:[%s6338_s0 + $0x18d] ss:$16 sm:%s1275_s24]   ;;  %s1445_s29 = smov 192  ;;  %s1491_s24 = smov 192 }
  0x6a   :  { %v1232_v40 = vsel %vm245_vm0, %v3114_v38, %v3113_v37  ;;  %v3115_v41 = vld [vmem:[%s6338_s0 + $0x385] ss:$16 sm:%s1234_s5]   ;;  %s1249_s5 = smov 3  ;;  %v1278_v54 = vsel %vm245_vm0, %v3124_v52, %v3123_v51  ;;  %v3125_v55 = vld [vmem:[%s6338_s0 + $0x18d] ss:$16 sm:%s1280_s30]   ;;  %s1295_s30 = smov 3 }
  0x6b   :  { %v3116_v42 = vld [vmem:[%s6338_s0 + $0x385] ss:$16 sm:%s1239_s7]   ;;  %v1237_v43 = vsel %vm250_vm1, %v3115_v41, %v1232_v40  ;;  %v3126_v56 = vld [vmem:[%s6338_s0 + $0x18d] ss:$16 sm:%s1285_s2]   ;;  %v1283_v57 = vsel %vm250_vm1, %v3125_v55, %v1278_v54  ;;  %s1298_s7 = smov 12  ;;  %s1344_s2 = smov 12 }
  0x6c   :  { %1174 = vrot.lane.b32.xlu0 %v1173_v39, %s3463_s22  ;;  %v3108_v44 = vld [vmem:[%s6338_s0 + $0x285] ss:$16 sm:%s1203_s10]   ;;  %v1242_v45 = vsel %vm255_vm2, %v3116_v42, %v1237_v43  ;;  %v1288_v59 = vsel %vm255_vm2, %v3126_v56, %v1283_v57  ;;  %s1514_s10 = smov 192 }
  0x6d   :  { %v3109_v46 = vld [vmem:[%s6338_s0 + $0x285] ss:$16 sm:%s1206_s14]   ;;  %1243 = vrot.lane.b32.xlu1 %v1242_v45, %s3463_s22  ;;  %s1532_s14 = smov 48 }
  0x6e   :  { %v3110_v47 = vld [vmem:[%s6338_s0 + $0x285] ss:$16 sm:%s1211_s15]   ;;  %v1209_v48 = vsel %vm245_vm0, %v3109_v46, %v3108_v44  ;;  %v3118_v58 = vld [vmem:[%s6338_s0 + $0x8d] ss:$16 sm:%s1249_s5]   ;;  %s1363_s15 = smov 3  ;;  %s1555_s5 = smov 48 }
  0x6f   :  { %v3111_v49 = vld [vmem:[%s6338_s0 + $0x285] ss:$16 sm:%s1216_s19]   ;;  %v1214_v50 = vsel %vm250_vm1, %v3110_v47, %v1209_v48  ;;  %s1321_s19 = smov 12  ;;  %v3119_v60 = vld [vmem:[%s6338_s0 + $0x8d] ss:$16 sm:%s1252_s11]   ;;  %s1409_s11 = smov 3 }
  0x70   :  { %v1219_v53 = vsel %vm255_vm2, %v3111_v49, %v1214_v50  ;;  %v3120_v61 = vld [vmem:[%s6338_s0 + $0x8d] ss:$16 sm:%s1257_s12]   ;;  %v1255_v62 = vsel %vm245_vm0, %v3119_v60, %v3118_v58  ;;  %v3142_v16 = vld [vmem:[%s6338_s0 + $0x104] ss:$16 sm:%s1363_s15]   ;;  %s1412_s12 = smov 12  ;;  %s4807_s15 = smov 48 }
  0x71   :  { %1220 = vrot.lane.b32.xlu0 %v1219_v53, %s3463_s22  ;;  %1289 = vrot.lane.b32.xlu1 %v1288_v59, %s3463_s22  ;;  %v3121_v63 = vld [vmem:[%s6338_s0 + $0x8d] ss:$16 sm:%s1262_s16]   ;;  %v1260_v0 = vsel %vm250_vm1, %v3120_v61, %v1255_v62  ;;  %s1366_s16 = smov 12 }
  0x72   :  { %v3133_v1 = vld [vmem:[%s6338_s0 + $0x38d] ss:$16 sm:%s1318_s18]   ;;  %v1265_v3 = vsel %vm255_vm2, %v3121_v63, %v1260_v0  ;;  %v3143_v17 = vld [vmem:[%s6338_s0 + $0x104] ss:$16 sm:%s1366_s16]   ;;  %s1417_s16 = smov 48  ;;  %s1486_s18 = smov 48 }
  0x73   :  { %v3134_v2 = vld [vmem:[%s6338_s0 + $0x38d] ss:$16 sm:%s1321_s19]   ;;  %v1369_v19 = vsel %vm245_vm0, %v3143_v17, %v3142_v16  ;;  %v3144_v20 = vld [vmem:[%s6338_s0 + $0x104] ss:$16 sm:%s1371_s20]   ;;  %s1386_s20 = smov 3  ;;  %s1537_s19 = smov 192 }
  0x74   :  { %v1324_v4 = vsel %vm245_vm0, %v3134_v2, %v3133_v1  ;;  %v3135_v5 = vld [vmem:[%s6338_s0 + $0x38d] ss:$16 sm:%s1326_s25]   ;;  %s1341_s25 = smov 3  ;;  %v3145_v21 = vld [vmem:[%s6338_s0 + $0x104] ss:$16 sm:%s1376_s21]   ;;  %v1374_v23 = vsel %vm250_vm1, %v3144_v20, %v1369_v19  ;;  %s1435_s21 = smov 12 }
  0x75   :  { %v3136_v6 = vld [vmem:[%s6338_s0 + $0x38d] ss:$16 sm:%s1331_s26]   ;;  %1266 = vrot.lane.b32.xlu0 %v1265_v3, %s3463_s22  ;;  %v1329_v7 = vsel %vm250_vm1, %v3135_v5, %v1324_v4  ;;  %v1379_v25 = vsel %vm255_vm2, %v3145_v21, %v1374_v23  ;;  %s1389_s26 = smov 12 }
  0x76   :  { %v3128_v8 = vld [vmem:[%s6338_s0 + $0x28d] ss:$16 sm:%s1295_s30]   ;;  %v1334_v9 = vsel %vm255_vm2, %v3136_v6, %v1329_v7  ;;  %v3138_v24 = vld [vmem:[%s6338_s0 + $0x4] ss:$16 sm:%s1341_s25]   ;;  %s1601_s25 = smov 48  ;;  %s1624_s30 = smov 48 }
  0x77   :  { %v3129_v10 = vld [vmem:[%s6338_s0 + $0x28d] ss:$16 sm:%s1298_s7]   ;;  %1335 = vrot.lane.b32.xlu1 %v1334_v9, %s3463_s22  ;;  %s1560_s7 = smov 192 }
  0x78   :  { %v3130_v11 = vld [vmem:[%s6338_s0 + $0x28d] ss:$16 sm:%s1303_s8]   ;;  %v1301_v12 = vsel %vm245_vm0, %v3129_v10, %v3128_v8  ;;  %v4243_v14 = vpop.permute.xlu1 %302   ;;  %v3139_v26 = vld [vmem:[%s6338_s0 + $0x4] ss:$16 sm:%s1344_s2]   ;;  %s1455_s8 = smov 3  ;;  %s1606_s2 = smov 192 }
  0x79   :  { %v3131_v13 = vld [vmem:[%s6338_s0 + $0x28d] ss:$16 sm:%s1308_s13]   ;;  %v1306_v15 = vsel %vm250_vm1, %v3130_v11, %v1301_v12  ;;  %v3140_v27 = vld [vmem:[%s6338_s0 + $0x4] ss:$16 sm:%s1349_s3]   ;;  %v1347_v29 = vsel %vm245_vm0, %v3139_v26, %v3138_v24  ;;  %s1463_s13 = smov 48  ;;  %s1501_s3 = smov 3 }
  0x7a   :  { %v1311_v18 = vsel %vm255_vm2, %v3131_v13, %v1306_v15  ;;  %v3141_v30 = vld [vmem:[%s6338_s0 + $0x4] ss:$16 sm:%s1354_s9]   ;;  %v1352_v31 = vsel %vm250_vm1, %v3140_v27, %v1347_v29  ;;  %s1458_s9 = smov 12  ;;  %v3162_v48 = vld [vmem:[%s6338_s0 + $0x10c] ss:$16 sm:%s1455_s8]   ;;  %s1578_s8 = smov 48 }
  0x7b   :  { %1312 = vrot.lane.b32.xlu0 %v1311_v18, %s3463_s22  ;;  %1380 = vrot.lane.b32.xlu1 %v1379_v25, %s3464_s6  ;;  %v3152_v32 = vld [vmem:[%s6338_s0 + $0x304] ss:$16 sm:%s1409_s11]   ;;  %v1357_v34 = vsel %vm255_vm2, %v3141_v30, %v1352_v31  ;;  %s1509_s22 = smov 48  ;;  %s4475_s11 = smov 3 }
  0x7c   :  { %v4260_v22 = vpop.permute.xlu0 %257   ;;  %v3153_v33 = vld [vmem:[%s6338_s0 + $0x304] ss:$16 sm:%s1412_s12]   ;;  %v3163_v49 = vld [vmem:[%s6338_s0 + $0x10c] ss:$16 sm:%s1458_s9]   ;;  %s1583_s12 = smov 192  ;;  %s2037_s9 = smov 48 }
  0x7d   :  { %v1415_v35 = vsel %vm245_vm0, %v3153_v33, %v3152_v32  ;;  %v3154_v36 = vld [vmem:[%s6338_s0 + $0x304] ss:$16 sm:%s1417_s16]   ;;  %s1432_s16 = smov 3  ;;  %v1461_v51 = vsel %vm245_vm0, %v3163_v49, %v3162_v48  ;;  %v3164_v52 = vld [vmem:[%s6338_s0 + $0x10c] ss:$16 sm:%s1463_s13]   ;;  %s1478_s13 = smov 3 }
  0x7e   :  { %v3155_v37 = vld [vmem:[%s6338_s0 + $0x304] ss:$16 sm:%s1422_s17]   ;;  %v1420_v39 = vsel %vm250_vm1, %v3154_v36, %v1415_v35  ;;  %v3165_v53 = vld [vmem:[%s6338_s0 + $0x10c] ss:$16 sm:%s1468_s27]   ;;  %v1466_v55 = vsel %vm250_vm1, %v3164_v52, %v1461_v51  ;;  %s1481_s17 = smov 12  ;;  %s1527_s27 = smov 12 }
  0x7f   :  { %1358 = vrot.lane.b32.xlu0 %v1357_v34, %s3464_s6  ;;  %v3147_v40 = vld [vmem:[%s6338_s0 + $0x204] ss:$16 sm:%s1386_s20]   ;;  %v1425_v41 = vsel %vm255_vm2, %v3155_v37, %v1420_v39  ;;  %v1471_v57 = vsel %vm255_vm2, %v3165_v53, %v1466_v55  ;;  %s1593_s20 = smov 3  ;;  %v2829_v52 = vld [vmem:[%s6338_s0 + $0x100] ss:$8 sm:$0xf]  }
  0x80   :  { %v4274_v28 = vpop.permute.xlu1 %325   ;;  %v3148_v42 = vld [vmem:[%s6338_s0 + $0x204] ss:$16 sm:%s1389_s26]   ;;  %1426 = vrot.lane.b32.xlu1 %v1425_v41, %s3464_s6  ;;  %s4566_s26 = smov 48 }
  0x81   :  { %v3149_v43 = vld [vmem:[%s6338_s0 + $0x204] ss:$16 sm:%s1394_s28]   ;;  %v1392_v45 = vsel %vm245_vm0, %v3148_v42, %v3147_v40  ;;  %v3157_v56 = vld [vmem:[%s6338_s0 + $0xc] ss:$16 sm:%s1432_s16]   ;;  %s1547_s28 = smov 3  ;;  %s4487_s16 = smov 48 }
  0x82   :  { %v3150_v46 = vld [vmem:[%s6338_s0 + $0x204] ss:$16 sm:%s1399_s4]   ;;  %v1397_v47 = vsel %vm250_vm1, %v3149_v43, %v1392_v45  ;;  %s1504_s4 = smov 12  ;;  %v3158_v58 = vld [vmem:[%s6338_s0 + $0xc] ss:$16 sm:%s1435_s21]   ;;  %s1652_s21 = smov 192 }
  0x83   :  { %v1402_v50 = vsel %vm255_vm2, %v3150_v46, %v1397_v47  ;;  %v3159_v59 = vld [vmem:[%s6338_s0 + $0xc] ss:$16 sm:%s1440_s23]   ;;  %v1438_v61 = vsel %vm245_vm0, %v3158_v58, %v3157_v56  ;;  %v3182_v17 = vld [vmem:[%s6338_s0 + $0x184] ss:$16 sm:%s1547_s28]   ;;  %s4447_s23 = smov 3  ;;  %s2100_s28 = smov 12 }
  0x84   :  { %v4296_v38 = vpop.permute.xlu0 %279   ;;  %v4310_v44 = vpop.permute.xlu1 %371   ;;  %1403 = vrot.lane.b32.xlu0 %v1402_v50, %s3464_s6  ;;  %1472 = vrot.lane.b32.xlu1 %v1471_v57, %s3464_s6  ;;  %v3160_v62 = vld [vmem:[%s6338_s0 + $0xc] ss:$16 sm:%s1445_s29]   ;;  %v1443_v63 = vsel %vm250_vm1, %v3159_v59, %v1438_v61  ;;  %s1550_s29 = smov 12 }
  0x85   :  { %v3172_v0 = vld [vmem:[%s6338_s0 + $0x30c] ss:$16 sm:%s1501_s3]   ;;  %v1448_v2 = vsel %vm255_vm2, %v3160_v62, %v1443_v63  ;;  %v3183_v18 = vld [vmem:[%s6338_s0 + $0x184] ss:$16 sm:%s1550_s29]   ;;  %s1570_s3 = smov 3  ;;  %s1619_s29 = smov 12 }
  0x86   :  { %v3173_v1 = vld [vmem:[%s6338_s0 + $0x30c] ss:$16 sm:%s1504_s4]   ;;  %v1553_v20 = vsel %vm245_vm0, %v3183_v18, %v3182_v17  ;;  %v3184_v21 = vld [vmem:[%s6338_s0 + $0x184] ss:$16 sm:%s1555_s5]   ;;  %s4463_s4 = smov 192  ;;  %s4785_s5 = smov 3 }
  0x87   :  { %v1507_v3 = vsel %vm245_vm0, %v3173_v1, %v3172_v0  ;;  %v3174_v4 = vld [vmem:[%s6338_s0 + $0x30c] ss:$16 sm:%s1509_s22]   ;;  %s1524_s22 = smov 3  ;;  %v3185_v23 = vld [vmem:[%s6338_s0 + $0x184] ss:$16 sm:%s1560_s7]   ;;  %v1558_v25 = vsel %vm250_vm1, %v3184_v21, %v1553_v20  ;;  %s1573_s7 = smov 12 }
  0x88   :  { %v4332_v54 = vpop.permute.xlu0 %348   ;;  %v3175_v5 = vld [vmem:[%s6338_s0 + $0x30c] ss:$16 sm:%s1514_s10]   ;;  %1449 = vrot.lane.b32.xlu0 %v1448_v2, %s3464_s6  ;;  %v1512_v7 = vsel %vm250_vm1, %v3174_v4, %v1507_v3  ;;  %v1563_v27 = vsel %vm255_vm2, %v3185_v23, %v1558_v25  ;;  %v2830_v1 = vld [vmem:[%s6338_s0 + $0x100] ss:$8 sm:$0xf0]   ;;  %s5224_s10 = smov 3 }
  0x89   :  { %v3167_v8 = vld [vmem:[%s6338_s0 + $0x20c] ss:$16 sm:%s1478_s13]   ;;  %v1517_v9 = vsel %vm255_vm2, %v3175_v5, %v1512_v7  ;;  %v3177_v26 = vld [vmem:[%s6338_s0 + $0x84] ss:$16 sm:%s1524_s22]   ;;  %s1639_s13 = smov 3  ;;  %v64_v7 = vsel %vm4_vm3, %v2830_v1, %v2829_v52  ;;  %s4590_s22 = smov 12 }
  0x8a   :  { %v4346_v60 = vpop.permute.xlu1 %417   ;;  %v3168_v10 = vld [vmem:[%s6338_s0 + $0x20c] ss:$16 sm:%s1481_s17]   ;;  %1518 = vrot.lane.b32.xlu1 %v1517_v9, %s3464_s6  ;;  %s1642_s17 = smov 12  ;;  %2831 = vst.msk [vmem:[%s6339_s1 + $0x20] ss:$8 sm:$0x3] %vm6_vm4, %v64_v7  }
  0x8b   :  { %v3169_v11 = vld [vmem:[%s6338_s0 + $0x20c] ss:$16 sm:%s1486_s18]   ;;  %v1484_v13 = vsel %vm245_vm0, %v3168_v10, %v3167_v8  ;;  %v3178_v29 = vld [vmem:[%s6338_s0 + $0x84] ss:$16 sm:%s1527_s27]   ;;  %s1647_s18 = smov 48  ;;  %s4647_s27 = smov 48 }
  0x8c   :  { %v3170_v15 = vld [vmem:[%s6338_s0 + $0x20c] ss:$16 sm:%s1491_s24]   ;;  %v1489_v16 = vsel %vm250_vm1, %v3169_v11, %v1484_v13  ;;  %s1596_s24 = smov 12  ;;  %v3179_v30 = vld [vmem:[%s6338_s0 + $0x84] ss:$16 sm:%s1532_s14]   ;;  %v1530_v32 = vsel %vm245_vm0, %v3178_v29, %v3177_v26 }
  0x8d   :  { %v1494_v19 = vsel %vm255_vm2, %v3170_v15, %v1489_v16  ;;  %v3180_v33 = vld [vmem:[%s6338_s0 + $0x84] ss:$16 sm:%s1537_s19]   ;;  %v1535_v34 = vsel %vm250_vm1, %v3179_v30, %v1530_v32  ;;  %v3202_v55 = vld [vmem:[%s6338_s0 + $0x18c] ss:$16 sm:%s1639_s13]   ;;  %s4709_s19 = smov 3  ;;  %s4904_s13 = smov 12 }
  0x8e   :  { %v4368_v6 = vpop.permute.xlu0 %394   ;;  %v4382_v12 = vpop.permute.xlu1 %463   ;;  %1495 = vrot.lane.b32.xlu0 %v1494_v19, %s3464_s6  ;;  %1564 = vrot.lane.b32.xlu1 %v1563_v27, %s3464_s6  ;;  %v3192_v35 = vld [vmem:[%s6338_s0 + $0x384] ss:$16 sm:%s1593_s20]   ;;  %v1540_v37 = vsel %vm255_vm2, %v3180_v33, %v1535_v34  ;;  %s4499_s20 = smov 3 }
  0x8f   :  { %v3193_v36 = vld [vmem:[%s6338_s0 + $0x384] ss:$16 sm:%s1596_s24]   ;;  %v3203_v56 = vld [vmem:[%s6338_s0 + $0x18c] ss:$16 sm:%s1642_s17]   ;;  %s4489_s17 = smov 192  ;;  %s1991_s24 = smov 48 }
  0x90   :  { %v1599_v39 = vsel %vm245_vm0, %v3193_v36, %v3192_v35  ;;  %v3194_v40 = vld [vmem:[%s6338_s0 + $0x384] ss:$16 sm:%s1601_s25]   ;;  %v1645_v58 = vsel %vm245_vm0, %v3203_v56, %v3202_v55  ;;  %v3204_v59 = vld [vmem:[%s6338_s0 + $0x18c] ss:$16 sm:%s1647_s18]   ;;  %s3465_s25 = smov 48   ;;  %s5232_s18 = smov 12 }
  0x91   :  { %v3195_v41 = vld [vmem:[%s6338_s0 + $0x384] ss:$16 sm:%s1606_s2]   ;;  %v1604_v43 = vsel %vm250_vm1, %v3194_v40, %v1599_v39  ;;  %v3205_v61 = vld [vmem:[%s6338_s0 + $0x18c] ss:$16 sm:%s1652_s21]   ;;  %v1650_v63 = vsel %vm250_vm1, %v3204_v59, %v1645_v58  ;;  %s1761_s2 = smov 48  ;;  %s5289_s21 = smov 12 }
  0x92   :  { %v4404_v24 = vpop.permute.xlu0 %440   ;;  %1541 = vrot.lane.b32.xlu0 %v1540_v37, %s3464_s6  ;;  %v3187_v45 = vld [vmem:[%s6338_s0 + $0x284] ss:$16 sm:%s1570_s3]   ;;  %v1609_v46 = vsel %vm255_vm2, %v3195_v41, %v1604_v43  ;;  %v1655_v2 = vsel %vm255_vm2, %v3205_v61, %v1650_v63  ;;  %2832 = vst.msk [vmem:[%s6339_s1 + $0x11] ss:$8 sm:$0xc] %vm6_vm4, %v64_v7   ;;  %s4626_s3 = smov 3 }
  0x93   :  { %v4418_v31 = vpop.permute.xlu1 %509   ;;  %v3188_v47 = vld [vmem:[%s6338_s0 + $0x284] ss:$16 sm:%s1573_s7]   ;;  %1610 = vrot.lane.b32.xlu1 %v1609_v46, %s3464_s6  ;;  %2833 = vst.msk [vmem:[%s6339_s1 + $0x2] ss:$8 sm:$0x30] %vm6_vm4, %v64_v7   ;;  %s4943_s7 = smov 3 }
  0x94   :  { %v3189_v48 = vld [vmem:[%s6338_s0 + $0x284] ss:$16 sm:%s1578_s8]   ;;  %v1576_v50 = vsel %vm245_vm0, %v3188_v47, %v3187_v45  ;;  %v3197_v0 = vld [vmem:[%s6338_s0 + $0x8c] ss:$16 sm:%s4447_s23]   ;;  %s5032_s23 = smov 3  ;;  %s5057_s8 = smov 192 }
  0x95   :  { %v3190_v51 = vld [vmem:[%s6338_s0 + $0x284] ss:$16 sm:%s1583_s12]   ;;  %v1581_v53 = vsel %vm250_vm1, %v3189_v48, %v1576_v50  ;;  %s4477_s12 = smov 12  ;;  %v3198_v3 = vld [vmem:[%s6338_s0 + $0x8c] ss:$16 sm:%s1619_s29]   ;;  %s4511_s29 = smov 12 }
  0x96   :  { %v1586_v57 = vsel %vm255_vm2, %v3190_v51, %v1581_v53  ;;  %v3199_v4 = vld [vmem:[%s6338_s0 + $0x8c] ss:$16 sm:%s1624_s30]   ;;  %s4513_s30 = smov 48  ;;  %v1622_v8 = vsel %vm245_vm0, %v3198_v3, %v3197_v0  ;;  %2834 = vst.msk [vmem:[%s6339_s1 - $0xd] ss:$8 sm:$0xc0] %vm6_vm4, %v64_v7  }
  0x97   :  { %v4440_v42 = vpop.permute.xlu0 %486   ;;  %v4456_v49 = vpop.permute.xlu1 %555   ;;  %1587 = vrot.lane.b32.xlu0 %v1586_v57, %s3464_s6  ;;  %1656 = vrot.lane.b32.xlu1 %v1655_v2, %s3464_s6  ;;  %v3200_v9 = vld [vmem:[%s6338_s0 + $0x8c] ss:$16 sm:%s4463_s4]   ;;  %s4524_s4 = smov 192  ;;  %v1627_v11 = vsel %vm250_vm1, %v3199_v4, %v1622_v8 }
  0x98   :  { %v2835_v10 = vld [vmem:[%s6338_s0 + $0x140] ss:$8 sm:$0xf]   ;;  %v3212_v13 = vld [vmem:[%s6338_s0 + $0x38c] ss:$16 sm:%s4475_s11]   ;;  %v1632_v16 = vsel %vm255_vm2, %v3200_v9, %v1627_v11  ;;  %s5134_s11 = smov 48 }
  0x99   :  { %v3213_v15 = vld [vmem:[%s6338_s0 + $0x38c] ss:$16 sm:%s4477_s12]   ;;  %s4554_s12 = smov 3  ;;  %v2836_v25 = vld [vmem:[%s6338_s0 + $0x140] ss:$8 sm:$0xf0]  }
  0x9a   :  { %v1691_v17 = vsel %vm245_vm0, %v3213_v15, %v3212_v13  ;;  %v3214_v18 = vld [vmem:[%s6338_s0 + $0x38c] ss:$16 sm:%s4487_s16]   ;;  %v79_v32 = vsel %vm4_vm3, %v2836_v25, %v2835_v10  ;;  %v2_v35 = vld [vmem:[%s6338_s0] ss:$8 sm:$0xf]   ;;  %s4672_s16 = smov 12 }
  0x9b   :  { %v4491_v62 = vpop.permute.xlu0 %532   ;;  %v3215_v19 = vld [vmem:[%s6338_s0 + $0x38c] ss:$16 sm:%s4489_s17]   ;;  %s1733_s17 = smov 12  ;;  %1633 = vrot.lane.b32.xlu0 %v1632_v16, %s3464_s6  ;;  %v1696_v21 = vsel %vm250_vm1, %v3214_v18, %v1691_v17  ;;  %2837 = vst.msk [vmem:[%s6339_s1 + $0x24] ss:$8 sm:$0x3] %vm6_vm4, %v79_v32  }
  0x9c   :  { %v3207_v23 = vld [vmem:[%s6338_s0 + $0x28c] ss:$16 sm:%s4499_s20]   ;;  %s1743_s20 = smov 192  ;;  %v1701_v26 = vsel %vm255_vm2, %v3215_v19, %v1696_v21  ;;  %2838 = vst.msk [vmem:[%s6339_s1 + $0x15] ss:$8 sm:$0xc] %vm6_vm4, %v79_v32  }
  0x9d   :  { %v4515_v5 = vpop.permute.xlu1 %601   ;;  %v3208_v27 = vld [vmem:[%s6338_s0 + $0x28c] ss:$16 sm:%s4511_s29]   ;;  %1702 = vrot.lane.b32.xlu1 %v1701_v26, %s3464_s6  ;;  %2839 = vst.msk [vmem:[%s6339_s1 + $0x6] ss:$8 sm:$0x30] %vm6_vm4, %v79_v32   ;;  %s4744_s29 = smov 12 }
  0x9e   :  { %v3209_v29 = vld [vmem:[%s6338_s0 + $0x28c] ss:$16 sm:%s4513_s30]   ;;  %s4588_s30 = smov 3  ;;  %v1668_v33 = vsel %vm245_vm0, %v3208_v27, %v3207_v23  ;;  %2840 = vst.msk [vmem:[%s6339_s1 - $0x9] ss:$8 sm:$0xc0] %vm6_vm4, %v79_v32  }
  0x9f   :  { %v3210_v34 = vld [vmem:[%s6338_s0 + $0x28c] ss:$16 sm:%s4524_s4]   ;;  %s1716_s4 = smov 48  ;;  %v1673_v36 = vsel %vm250_vm1, %v3209_v29, %v1668_v33  ;;  %v3221_v37 = vld [vmem:[%s6338_s0 + $0x103] ss:$16 sm:%s4554_s12]   ;;  %s5369_s12 = smov 3 }
  0xa0   :  { %v3222_v39 = vld [vmem:[%s6338_s0 + $0x103] ss:$16 sm:%s1733_s17]   ;;  %s1721_s17 = smov 192  ;;  %2909 = vst.msk [vmem:[%s6339_s1 + $0x20] sm:$0xff] %vm259_vm6, %v4296_v38   ;;  %2929 = vst.msk [vmem:[%s6339_s1 + $0x28] sm:$0xff] %vm259_vm6, %v4310_v44   ;;  %v1678_v38 = vsel %vm255_vm2, %v3210_v34, %v1673_v36 }
  0xa1   :  { %v4568_v20 = vpop.permute.xlu0 %578   ;;  %v647_v30 = vpop.permute.xlu1 %646   ;;  %v1736_v44 = vsel %vm245_vm0, %v3222_v39, %v3221_v37  ;;  %v3223_v40 = vld [vmem:[%s6338_s0 + $0x103] ss:$16 sm:%s4566_s26]   ;;  %1679 = vrot.lane.b32.xlu0 %v1678_v38, %s3464_s6  ;;  %v3_v47 = vld [vmem:[%s6338_s0] ss:$8 sm:$0xf0]   ;;  %s4752_s26 = smov 48 }
  0xa2   :  { %v3224_v41 = vld [vmem:[%s6338_s0 + $0x103] ss:$16 sm:%s1743_s20]   ;;  %s1779_s20 = smov 12  ;;  %2988 = vst.msk [vmem:[%s6339_s1 + $0x20] sm:$0xff] %vm626_vm5, %v647_v30   ;;  %v1741_v45 = vsel %vm250_vm1, %v3223_v40, %v1736_v44  ;;  %v5_v52 = vsel %vm4_vm3, %v3_v47, %v2_v35  ;;  %s4914_s6 = smov 48 }
  0xa3   :  { %v3217_v46 = vld [vmem:[%s6338_s0 + $0x3] ss:$16 sm:%s4588_s30]   ;;  %s1789_s30 = smov 192  ;;  %v1746_v48 = vsel %vm255_vm2, %v3224_v41, %v1741_v45  ;;  %7 = vst.msk [vmem:[%s6339_s1] ss:$8 sm:$0x3] %vm6_vm4, %v5_v52  }
  0xa4   :  { %v3218_v50 = vld [vmem:[%s6338_s0 + $0x3] ss:$16 sm:%s4590_s22]   ;;  %1747 = vrot.lane.b32.xlu1 %v1746_v48, %s3465_s25  ;;  %2808 = vst.msk [vmem:[%s6339_s1 - $0xf] ss:$8 sm:$0xc] %vm6_vm4, %v5_v52   ;;  %s4720_s22 = smov 48 }
  0xa5   :  { %v4653_v43 = vpop.permute.xlu0 %624   ;;  %v3219_v51 = vld [vmem:[%s6338_s0 + $0x3] ss:$16 sm:%s1716_s4]   ;;  %s1753_s4 = smov 3  ;;  %v1714_v55 = vsel %vm245_vm0, %v3218_v50, %v3217_v46  ;;  %2809 = vst.msk [vmem:[%s6339_s1 - $0x1e] ss:$8 sm:$0x30] %vm6_vm4, %v5_v52  }
  0xa6   :  { %v4675_v53 = vpop.permute.xlu1 %692   ;;  %v3220_v56 = vld [vmem:[%s6338_s0 + $0x3] ss:$16 sm:%s1721_s17]   ;;  %2810 = vst.msk [vmem:[%s6339_s1 - $0x2d] ss:$8 sm:$0xc0] %vm6_vm4, %v5_v52   ;;  %v1719_v58 = vsel %vm250_vm1, %v3219_v51, %v1714_v55  ;;  %s5160_s17 = smov 12 }
  0xa7   :  { %v2811_v57 = vld [vmem:[%s6338_s0 + $0x40] ss:$8 sm:$0xf]   ;;  %v3231_v59 = vld [vmem:[%s6338_s0 + $0x303] ss:$16 sm:%s4626_s3]   ;;  %v1724_v63 = vsel %vm255_vm2, %v3220_v56, %v1719_v58  ;;  %s4964_s3 = smov 48 }
  0xa8   :  { %v3232_v61 = vld [vmem:[%s6338_s0 + $0x303] ss:$16 sm:%s1779_s20]   ;;  %s1766_s20 = smov 192  ;;  %1725 = vrot.lane.b32.xlu0 %v1724_v63, %s3465_s25  ;;  %v2812_v8 = vld [vmem:[%s6338_s0 + $0x40] ss:$8 sm:$0xf0]  }
  0xa9   :  { %v1782_v0 = vsel %vm245_vm0, %v3232_v61, %v3231_v59  ;;  %v3233_v1 = vld [vmem:[%s6338_s0 + $0x303] ss:$16 sm:%s4647_s27]   ;;  %v19_v13 = vsel %vm4_vm3, %v2812_v8, %v2811_v57  ;;  %v2877_v18 = vld [vmem:[%s6338_s0 + $0x300] ss:$8 sm:$0xf]   ;;  %s4871_s27 = smov 3 }
  0xaa   :  { %v3234_v2 = vld [vmem:[%s6338_s0 + $0x303] ss:$16 sm:%s1789_s30]   ;;  %s1825_s30 = smov 12  ;;  %v4722_v3 = vpop.permute.xlu0 %669   ;;  %v1787_v4 = vsel %vm250_vm1, %v3233_v1, %v1782_v0  ;;  %v739_v15 = vpop.permute.xlu1 %738   ;;  %2813 = vst.msk [vmem:[%s6339_s1 + $0x4] ss:$8 sm:$0x3] %vm6_vm4, %v19_v13  }
  0xab   :  { %v3226_v7 = vld [vmem:[%s6338_s0 + $0x203] ss:$16 sm:%s1753_s4]   ;;  %s4729_s4 = smov 192  ;;  %v1792_v9 = vsel %vm255_vm2, %v3234_v2, %v1787_v4  ;;  %2814 = vst.msk [vmem:[%s6339_s1 - $0xb] ss:$8 sm:$0xc] %vm6_vm4, %v19_v13  }
  0xac   :  { %v3227_v10 = vld [vmem:[%s6338_s0 + $0x203] ss:$16 sm:%s4672_s16]   ;;  %1793 = vrot.lane.b32.xlu1 %v1792_v9, %s3465_s25  ;;  %2815 = vst.msk [vmem:[%s6339_s1 - $0x1a] ss:$8 sm:$0x30] %vm6_vm4, %v19_v13   ;;  %s2088_s16 = smov 192 }
  0xad   :  { %v3228_v11 = vld [vmem:[%s6338_s0 + $0x203] ss:$16 sm:%s1761_s2]   ;;  %s4742_s2 = smov 3  ;;  %v1759_v16 = vsel %vm245_vm0, %v3227_v10, %v3226_v7  ;;  %2816 = vst.msk [vmem:[%s6339_s1 - $0x29] ss:$8 sm:$0xc0] %vm6_vm4, %v19_v13  }
  0xae   :  { %v3229_v17 = vld [vmem:[%s6338_s0 + $0x203] ss:$16 sm:%s1766_s20]   ;;  %3008 = vst.msk [vmem:[%s6339_s1 + $0x28] sm:$0xff] %vm626_vm5, %v739_v15   ;;  %v1764_v19 = vsel %vm250_vm1, %v3228_v11, %v1759_v16  ;;  %v716_v27 = vpop.permute.xlu0 %715   ;;  %v2878_v32 = vld [vmem:[%s6338_s0 + $0x300] ss:$8 sm:$0xf0]  }
  0xaf   :  { %v3241_v21 = vld [vmem:[%s6338_s0 + $0x10b] ss:$16 sm:%s4709_s19]   ;;  %260 = vst.msk [vmem:[%s6339_s1] sm:$0xff] %vm259_vm6, %v4260_v22   ;;  %2924 = vst.msk [vmem:[%s6339_s1 + $0x8] sm:$0xff] %vm259_vm6, %v4332_v54   ;;  %v1769_v22 = vsel %vm255_vm2, %v3229_v17, %v1764_v19  ;;  %s4836_s19 = smov 12  ;;  %v184_v36 = vsel %vm4_vm3, %v2878_v32, %v2877_v18 }
  0xb0   :  { %v3242_v23 = vld [vmem:[%s6338_s0 + $0x10b] ss:$16 sm:%s1825_s30]   ;;  %s1812_s30 = smov 192  ;;  %627 = vst.msk [vmem:[%s6339_s1] sm:$0xff] %vm626_vm5, %v4653_v43   ;;  %1770 = vrot.lane.b32.xlu0 %v1769_v22, %s3465_s25  ;;  %v785_v37 = vpop.permute.xlu1 %784  }
  0xb1   :  { %v1828_v54 = vsel %vm245_vm0, %v3242_v23, %v3241_v21  ;;  %v3243_v25 = vld [vmem:[%s6338_s0 + $0x10b] ss:$16 sm:%s4720_s22]   ;;  %3003 = vst.msk [vmem:[%s6339_s1 + $0x8] sm:$0xff] %vm626_vm5, %v716_v27   ;;  %v2883_v44 = vld [vmem:[%s6338_s0 + $0x340] ss:$8 sm:$0xf]  }
  0xb2   :  { %v3244_v26 = vld [vmem:[%s6338_s0 + $0x10b] ss:$16 sm:%s4729_s4]   ;;  %s1871_s4 = smov 12  ;;  %v1833_v29 = vsel %vm250_vm1, %v3243_v25, %v1828_v54  ;;  %2879 = vst.msk [vmem:[%s6339_s1 + $0x60] ss:$8 sm:$0x3] %vm6_vm4, %v184_v36  }
  0xb3   :  { %v3236_v30 = vld [vmem:[%s6338_s0 + $0xb] ss:$16 sm:%s4742_s2]   ;;  %s1881_s2 = smov 192  ;;  %v1838_v33 = vsel %vm255_vm2, %v3244_v26, %v1833_v29  ;;  %2880 = vst.msk [vmem:[%s6339_s1 + $0x51] ss:$8 sm:$0xc] %vm6_vm4, %v184_v36  }
  0xb4   :  { %v3237_v34 = vld [vmem:[%s6338_s0 + $0xb] ss:$16 sm:%s4744_s29]   ;;  %1839 = vrot.lane.b32.xlu1 %v1838_v33, %s3465_s25  ;;  %2881 = vst.msk [vmem:[%s6339_s1 + $0x42] ss:$8 sm:$0x30] %vm6_vm4, %v184_v36   ;;  %s4882_s29 = smov 48  ;;  %v4884_v50 = vpop.permute.xlu0 %761   ;;  %v4907_v61 = vpop.permute.xlu1 %830  }
  0xb5   :  { %v3238_v35 = vld [vmem:[%s6338_s0 + $0xb] ss:$16 sm:%s4752_s26]   ;;  %s1845_s26 = smov 3  ;;  %v1805_v39 = vsel %vm245_vm0, %v3237_v34, %v3236_v30  ;;  %2882 = vst.msk [vmem:[%s6339_s1 + $0x33] ss:$8 sm:$0xc0] %vm6_vm4, %v184_v36  }
  0xb6   :  { %v3239_v38 = vld [vmem:[%s6338_s0 + $0xb] ss:$16 sm:%s1812_s30]   ;;  %s1853_s30 = smov 48  ;;  %v1810_v40 = vsel %vm250_vm1, %v3238_v35, %v1805_v39  ;;  %v2884_v55 = vld [vmem:[%s6338_s0 + $0x340] ss:$8 sm:$0xf0]  }
  0xb7   :  { %v3251_v41 = vld [vmem:[%s6338_s0 + $0x30b] ss:$16 sm:%s4785_s5]   ;;  %v1815_v45 = vsel %vm255_vm2, %v3239_v38, %v1810_v40  ;;  %v199_v59 = vsel %vm4_vm3, %v2884_v55, %v2883_v44  ;;  %v2853_v1 = vld [vmem:[%s6338_s0 + $0x200] ss:$8 sm:$0xf]   ;;  %s5070_s22 = smov 12 }
  0xb8   :  { %v3252_v43 = vld [vmem:[%s6338_s0 + $0x30b] ss:$16 sm:%s1871_s4]   ;;  %s1858_s4 = smov 192  ;;  %1816 = vrot.lane.b32.xlu0 %v1815_v45, %s3465_s25  ;;  %2885 = vst.msk [vmem:[%s6339_s1 + $0x64] ss:$8 sm:$0x3] %vm6_vm4, %v199_v59  }
  0xb9   :  { %v1874_v46 = vsel %vm245_vm0, %v3252_v43, %v3251_v41  ;;  %v3253_v47 = vld [vmem:[%s6338_s0 + $0x30b] ss:$16 sm:%s4807_s15]   ;;  %2886 = vst.msk [vmem:[%s6339_s1 + $0x55] ss:$8 sm:$0xc] %vm6_vm4, %v199_v59   ;;  %v4998_v19 = vpop.permute.xlu1 %876   ;;  %s5287_s5 = smov 3 }
  0xba   :  { %v3254_v48 = vld [vmem:[%s6338_s0 + $0x30b] ss:$16 sm:%s1881_s2]   ;;  %s1917_s2 = smov 12  ;;  %v1879_v51 = vsel %vm250_vm1, %v3253_v47, %v1874_v46  ;;  %2887 = vst.msk [vmem:[%s6339_s1 + $0x46] ss:$8 sm:$0x30] %vm6_vm4, %v199_v59  }
  0xbb   :  { %v3246_v52 = vld [vmem:[%s6338_s0 + $0x20b] ss:$16 sm:%s1845_s26]   ;;  %s1927_s26 = smov 192  ;;  %v1884_v56 = vsel %vm255_vm2, %v3254_v48, %v1879_v51  ;;  %2888 = vst.msk [vmem:[%s6339_s1 + $0x37] ss:$8 sm:$0xc0] %vm6_vm4, %v199_v59  }
  0xbc   :  { %v3247_v57 = vld [vmem:[%s6338_s0 + $0x20b] ss:$16 sm:%s4836_s19]   ;;  %1885 = vrot.lane.b32.xlu1 %v1884_v56, %s3465_s25  ;;  %2919 = vst.msk [vmem:[%s6339_s1 + $0x60] sm:$0xff] %vm259_vm6, %v4274_v28   ;;  %s2510_s15 = smov 3 }
  0xbd   :  { %v3248_v58 = vld [vmem:[%s6338_s0 + $0x20b] ss:$16 sm:%s1853_s30]   ;;  %s4902_s30 = smov 3  ;;  %v1851_v63 = vsel %vm245_vm0, %v3247_v57, %v3246_v52  ;;  %v3261_v4 = vld [vmem:[%s6338_s0 + $0x183] ss:$16 sm:%s4871_s27]   ;;  %s4995_s27 = smov 12  ;;  %v5072_v40 = vpop.permute.xlu1 %922  }
  0xbe   :  { %v3249_v0 = vld [vmem:[%s6338_s0 + $0x20b] ss:$16 sm:%s1858_s4]   ;;  %v1856_v2 = vsel %vm250_vm1, %v3248_v58, %v1851_v63  ;;  %v3262_v7 = vld [vmem:[%s6338_s0 + $0x183] ss:$16 sm:%s1917_s2]   ;;  %s1904_s2 = smov 192 }
  0xbf   :  { %2939 = vst.msk [vmem:[%s6339_s1 + $0x68] sm:$0xff] %vm259_vm6, %v4346_v60   ;;  %v1861_v28 = vsel %vm255_vm2, %v3249_v0, %v1856_v2  ;;  %v1920_v60 = vsel %vm245_vm0, %v3262_v7, %v3261_v4  ;;  %v3263_v8 = vld [vmem:[%s6338_s0 + $0x183] ss:$16 sm:%s4882_s29]   ;;  %v2854_v13 = vld [vmem:[%s6338_s0 + $0x200] ss:$8 sm:$0xf0]  }
  0xc0   :  { %v3264_v9 = vld [vmem:[%s6338_s0 + $0x183] ss:$16 sm:%s1927_s26]   ;;  %s1963_s26 = smov 12  ;;  %2998 = vst.msk [vmem:[%s6339_s1 + $0x60] sm:$0xff] %vm626_vm5, %v4675_v53   ;;  %3018 = vst.msk [vmem:[%s6339_s1 + $0x68] sm:$0xff] %vm626_vm5, %v785_v37   ;;  %v4975_v53 = vpop.permute.xlu0 %807   ;;  %v1925_v10 = vsel %vm250_vm1, %v3263_v8, %v1920_v60  ;;  %v124_v18 = vsel %vm4_vm3, %v2854_v13, %v2853_v1  ;;  %s5440_s29 = smov 12 }
  0xc1   :  { %1862 = vrot.lane.b32.xlu0 %v1861_v28, %s3465_s25  ;;  %v3256_v11 = vld [vmem:[%s6338_s0 + $0x83] ss:$16 sm:%s4902_s30]   ;;  %s1973_s30 = smov 192  ;;  %v1930_v15 = vsel %vm255_vm2, %v3264_v9, %v1925_v10  ;;  %2855 = vst.msk [vmem:[%s6339_s1 + $0x40] ss:$8 sm:$0x3] %vm6_vm4, %v124_v18  }
  0xc2   :  { %v3257_v16 = vld [vmem:[%s6338_s0 + $0x83] ss:$16 sm:%s4904_s13]   ;;  %1931 = vrot.lane.b32.xlu1 %v1930_v15, %s3465_s25  ;;  %2856 = vst.msk [vmem:[%s6339_s1 + $0x31] ss:$8 sm:$0xc] %vm6_vm4, %v124_v18   ;;  %s5045_s13 = smov 48 }
  0xc3   :  { %v3258_v17 = vld [vmem:[%s6338_s0 + $0x83] ss:$16 sm:%s4914_s6]   ;;  %s1937_s6 = smov 3  ;;  %v1897_v21 = vsel %vm245_vm0, %v3257_v16, %v3256_v11  ;;  %2857 = vst.msk [vmem:[%s6339_s1 + $0x22] ss:$8 sm:$0x30] %vm6_vm4, %v124_v18   ;;  %v5163_v0 = vpop.permute.xlu1 %968  }
  0xc4   :  { %v3259_v23 = vld [vmem:[%s6338_s0 + $0x83] ss:$16 sm:%s1904_s2]   ;;  %s1945_s2 = smov 48  ;;  %2858 = vst.msk [vmem:[%s6339_s1 + $0x13] ss:$8 sm:$0xc0] %vm6_vm4, %v124_v18   ;;  %v1902_v54 = vsel %vm250_vm1, %v3258_v17, %v1897_v21  ;;  %v5047_v33 = vpop.permute.xlu0 %853  }
  0xc5   :  { %v2859_v22 = vld [vmem:[%s6338_s0 + $0x240] ss:$8 sm:$0xf]   ;;  %v3271_v25 = vld [vmem:[%s6338_s0 + $0x383] ss:$16 sm:%s4943_s7]   ;;  %v1907_v27 = vsel %vm255_vm2, %v3259_v23, %v1902_v54  ;;  %s5396_s7 = smov 12 }
  0xc6   :  { %v3272_v26 = vld [vmem:[%s6338_s0 + $0x383] ss:$16 sm:%s1963_s26]   ;;  %s1950_s26 = smov 192  ;;  %1908 = vrot.lane.b32.xlu0 %v1907_v27, %s3465_s25  ;;  %v2860_v36 = vld [vmem:[%s6338_s0 + $0x240] ss:$8 sm:$0xf0]  }
  0xc7   :  { %v1966_v29 = vsel %vm245_vm0, %v3272_v26, %v3271_v25  ;;  %v3273_v30 = vld [vmem:[%s6338_s0 + $0x383] ss:$16 sm:%s4964_s3]   ;;  %v139_v44 = vsel %vm4_vm3, %v2860_v36, %v2859_v22  ;;  %v2841_v45 = vld [vmem:[%s6338_s0 + $0x180] ss:$8 sm:$0xf]   ;;  %v1014_v54 = vpop.permute.xlu1 %1013   ;;  %s2248_s3 = smov 192 }
  0xc8   :  { %v3274_v32 = vld [vmem:[%s6338_s0 + $0x383] ss:$16 sm:%s1973_s30]   ;;  %s5043_s30 = smov 12  ;;  %v1971_v34 = vsel %vm250_vm1, %v3273_v30, %v1966_v29  ;;  %2861 = vst.msk [vmem:[%s6339_s1 + $0x44] ss:$8 sm:$0x3] %vm6_vm4, %v139_v44  }
  0xc9   :  { %v3266_v35 = vld [vmem:[%s6338_s0 + $0x283] ss:$16 sm:%s1937_s6]   ;;  %v1976_v37 = vsel %vm255_vm2, %v3274_v32, %v1971_v34  ;;  %2862 = vst.msk [vmem:[%s6339_s1 + $0x35] ss:$8 sm:$0xc] %vm6_vm4, %v139_v44   ;;  %s5320_s6 = smov 3 }
  0xca   :  { %v3267_v39 = vld [vmem:[%s6338_s0 + $0x283] ss:$16 sm:%s4995_s27]   ;;  %1977 = vrot.lane.b32.xlu1 %v1976_v37, %s3465_s25  ;;  %2863 = vst.msk [vmem:[%s6339_s1 + $0x26] ss:$8 sm:$0x30] %vm6_vm4, %v139_v44   ;;  %s5117_s27 = smov 3 }
  0xcb   :  { %v3268_v38 = vld [vmem:[%s6338_s0 + $0x283] ss:$16 sm:%s1945_s2]   ;;  %s5068_s2 = smov 3  ;;  %v1943_v41 = vsel %vm245_vm0, %v3267_v39, %v3266_v35  ;;  %2864 = vst.msk [vmem:[%s6339_s1 + $0x17] ss:$8 sm:$0xc0] %vm6_vm4, %v139_v44  }
  0xcc   :  { %v3269_v43 = vld [vmem:[%s6338_s0 + $0x283] ss:$16 sm:%s1950_s26]   ;;  %v1948_v46 = vsel %vm250_vm1, %v3268_v38, %v1943_v41  ;;  %2914 = vst.msk [vmem:[%s6339_s1 + $0x40] sm:$0xff] %vm259_vm6, %v4243_v14   ;;  %2934 = vst.msk [vmem:[%s6339_s1 + $0x48] sm:$0xff] %vm259_vm6, %v4368_v6   ;;  %s2151_s26 = smov 48 }
  0xcd   :  { %v3281_v14 = vld [vmem:[%s6338_s0 + $0x18b] ss:$16 sm:%s5032_s23]   ;;  %v1953_v47 = vsel %vm255_vm2, %v3269_v43, %v1948_v46  ;;  %2993 = vst.msk [vmem:[%s6339_s1 + $0x40] sm:$0xff] %vm626_vm5, %v4722_v3   ;;  %3013 = vst.msk [vmem:[%s6339_s1 + $0x48] sm:$0xff] %vm626_vm5, %v4884_v50   ;;  %v5141_v50 = vpop.permute.xlu0 %899   ;;  %v1060_v43 = vpop.permute.xlu1 %1059   ;;  %s2294_s23 = smov 192 }
  0xce   :  { %v3282_v6 = vld [vmem:[%s6338_s0 + $0x18b] ss:$16 sm:%s5043_s30]   ;;  %s1996_s30 = smov 192  ;;  %1954 = vrot.lane.b32.xlu0 %v1953_v47, %s3465_s25  ;;  %v2842_v56 = vld [vmem:[%s6338_s0 + $0x180] ss:$8 sm:$0xf0]  }
  0xcf   :  { %v2012_v3 = vsel %vm245_vm0, %v3282_v6, %v3281_v14  ;;  %v3283_v48 = vld [vmem:[%s6338_s0 + $0x18b] ss:$16 sm:%s5045_s13]   ;;  %v94_v63 = vsel %vm4_vm3, %v2842_v56, %v2841_v45  ;;  %v2847_v4 = vld [vmem:[%s6338_s0 + $0x1c0] ss:$8 sm:$0xf]   ;;  %3067 = vst.msk [vmem:[%s6339_s1 + $0x20] sm:$0xff] %vm993_vm7, %v1014_v54  }
  0xd0   :  { %v3284_v51 = vld [vmem:[%s6338_s0 + $0x18b] ss:$16 sm:%s5057_s8]   ;;  %s2055_s8 = smov 12  ;;  %v2017_v52 = vsel %vm250_vm1, %v3283_v48, %v2012_v3  ;;  %2843 = vst.msk [vmem:[%s6339_s1 + $0x30] ss:$8 sm:$0x3] %vm6_vm4, %v94_v63  }
  0xd1   :  { %v3276_v55 = vld [vmem:[%s6338_s0 + $0x8b] ss:$16 sm:%s5068_s2]   ;;  %s2065_s2 = smov 192  ;;  %v2022_v57 = vsel %vm255_vm2, %v3284_v51, %v2017_v52  ;;  %2844 = vst.msk [vmem:[%s6339_s1 + $0x21] ss:$8 sm:$0xc] %vm6_vm4, %v94_v63   ;;  %v5206_v13 = vpop.permute.xlu0 %945  }
  0xd2   :  { %v3277_v58 = vld [vmem:[%s6338_s0 + $0x8b] ss:$16 sm:%s5070_s22]   ;;  %2023 = vrot.lane.b32.xlu1 %v2022_v57, %s3465_s25  ;;  %2845 = vst.msk [vmem:[%s6339_s1 + $0x12] ss:$8 sm:$0x30] %vm6_vm4, %v94_v63   ;;  %s2220_s13 = smov 48 }
  0xd3   :  { %v3278_v59 = vld [vmem:[%s6338_s0 + $0x8b] ss:$16 sm:%s1991_s24]   ;;  %s2029_s24 = smov 3  ;;  %v1989_v1 = vsel %vm245_vm0, %v3277_v58, %v3276_v55  ;;  %2846 = vst.msk [vmem:[%s6339_s1 + $0x3] ss:$8 sm:$0xc0] %vm6_vm4, %v94_v63  }
  0xd4   :  { %v3279_v2 = vld [vmem:[%s6338_s0 + $0x8b] ss:$16 sm:%s1996_s30]   ;;  %v1994_v7 = vsel %vm250_vm1, %v3278_v59, %v1989_v1  ;;  %v2848_v17 = vld [vmem:[%s6338_s0 + $0x1c0] ss:$8 sm:$0xf0]   ;;  %3077 = vst.msk [vmem:[%s6339_s1 + $0x60] sm:$0xff] %vm993_vm7, %v1060_v43   ;;  %v1106_v1 = vpop.permute.xlu1 %1105  }
  0xd5   :  { %v3291_v28 = vld [vmem:[%s6338_s0 + $0x38b] ss:$16 sm:%s5117_s27]   ;;  %v1999_v8 = vsel %vm255_vm2, %v3279_v2, %v1994_v7  ;;  %v109_v22 = vsel %vm4_vm3, %v2848_v17, %v2847_v4  ;;  %v2817_v27 = vld [vmem:[%s6338_s0 + $0x80] ss:$8 sm:$0xf]   ;;  %s2123_s27 = smov 12 }
  0xd6   :  { %v3292_v60 = vld [vmem:[%s6338_s0 + $0x38b] ss:$16 sm:%s2055_s8]   ;;  %s2042_s8 = smov 192  ;;  %2000 = vrot.lane.b32.xlu0 %v1999_v8, %s3465_s25  ;;  %2849 = vst.msk [vmem:[%s6339_s1 + $0x34] ss:$8 sm:$0x3] %vm6_vm4, %v109_v22  }
  0xd7   :  { %v2058_v9 = vsel %vm245_vm0, %v3292_v60, %v3291_v28  ;;  %v3293_v10 = vld [vmem:[%s6338_s0 + $0x38b] ss:$16 sm:%s5134_s11]   ;;  %2850 = vst.msk [vmem:[%s6339_s1 + $0x25] ss:$8 sm:$0xc] %vm6_vm4, %v109_v22   ;;  %s2284_s11 = smov 12 }
  0xd8   :  { %v3294_v11 = vld [vmem:[%s6338_s0 + $0x38b] ss:$16 sm:%s2065_s2]   ;;  %s2097_s2 = smov 3  ;;  %v2063_v15 = vsel %vm250_vm1, %v3293_v10, %v2058_v9  ;;  %2851 = vst.msk [vmem:[%s6339_s1 + $0x16] ss:$8 sm:$0x30] %vm6_vm4, %v109_v22   ;;  %v1152_v54 = vpop.permute.xlu1 %1151  }
  0xd9   :  { %v3286_v16 = vld [vmem:[%s6338_s0 + $0x28b] ss:$16 sm:%s2029_s24]   ;;  %s2105_s24 = smov 48  ;;  %v2068_v18 = vsel %vm255_vm2, %v3294_v11, %v2063_v15  ;;  %2852 = vst.msk [vmem:[%s6339_s1 + $0x7] ss:$8 sm:$0xc0] %vm6_vm4, %v109_v22  }
  0xda   :  { %v3287_v21 = vld [vmem:[%s6338_s0 + $0x28b] ss:$16 sm:%s5160_s17]   ;;  %2069 = vrot.lane.b32.xlu1 %v2068_v18, %s3465_s25  ;;  %2949 = vst.msk [vmem:[%s6339_s1 + $0x30] sm:$0xff] %vm259_vm6, %v4382_v12  }
  0xdb   :  { %v3288_v23 = vld [vmem:[%s6338_s0 + $0x28b] ss:$16 sm:%s2037_s9]   ;;  %s2110_s9 = smov 192  ;;  %v2035_v25 = vsel %vm245_vm0, %v3287_v21, %v3286_v16  ;;  %v3300_v30 = vld [vmem:[%s6338_s0 + $0x102] ss:$16 sm:%s2097_s2]   ;;  %s5318_s2 = smov 192 }
  0xdc   :  { %v3289_v26 = vld [vmem:[%s6338_s0 + $0x28b] ss:$16 sm:%s2042_s8]   ;;  %v2040_v29 = vsel %vm250_vm1, %v3288_v23, %v2035_v25  ;;  %v3301_v32 = vld [vmem:[%s6338_s0 + $0x102] ss:$16 sm:%s2100_s28]   ;;  %s2083_s28 = smov 48  ;;  %s2235_s8 = smov 3 }
  0xdd   :  { %2969 = vst.msk [vmem:[%s6339_s1 + $0x38] sm:$0xff] %vm259_vm6, %v4456_v49   ;;  %v2045_v12 = vsel %vm255_vm2, %v3289_v26, %v2040_v29  ;;  %v2103_v49 = vsel %vm245_vm0, %v3301_v32, %v3300_v30  ;;  %v3302_v34 = vld [vmem:[%s6338_s0 + $0x102] ss:$16 sm:%s2105_s24]   ;;  %v2818_v39 = vld [vmem:[%s6338_s0 + $0x80] ss:$8 sm:$0xf0]  }
  0xde   :  { %v3303_v35 = vld [vmem:[%s6338_s0 + $0x102] ss:$16 sm:%s2110_s9]   ;;  %3028 = vst.msk [vmem:[%s6339_s1 + $0x30] sm:$0xff] %vm626_vm5, %v4907_v61   ;;  %3048 = vst.msk [vmem:[%s6339_s1 + $0x38] sm:$0xff] %vm626_vm5, %v5072_v40   ;;  %v992_v61 = vpop.permute.xlu0 %991   ;;  %v2108_v36 = vsel %vm250_vm1, %v3302_v34, %v2103_v49  ;;  %v34_v41 = vsel %vm4_vm3, %v2818_v39, %v2817_v27  ;;  %v1198_v34 = vpop.permute.xlu1 %1197  }
  0xdf   :  { %2046 = vrot.lane.b32.xlu0 %v2045_v12, %s3465_s25  ;;  %v3296_v37 = vld [vmem:[%s6338_s0 + $0x2] ss:$16 sm:%s5224_s10]   ;;  %994 = vst.msk [vmem:[%s6339_s1] sm:$0xff] %vm993_vm7, %v992_v61   ;;  %v2113_v38 = vsel %vm255_vm2, %v3303_v35, %v2108_v36  ;;  %s2225_s25 = smov 192 }
  0xe0   :  { %v3297_v44 = vld [vmem:[%s6338_s0 + $0x2] ss:$16 sm:%s5232_s18]   ;;  %2819 = vst.msk [vmem:[%s6339_s1 + $0x10] ss:$8 sm:$0x3] %vm6_vm4, %v34_v41   ;;  %s5422_s18 = smov 192 }
  0xe1   :  { %v3298_v40 = vld [vmem:[%s6338_s0 + $0x2] ss:$16 sm:%s2083_s28]   ;;  %s3466_s28 = smov 32   ;;  %v2081_v45 = vsel %vm245_vm0, %v3297_v44, %v3296_v37  ;;  %2820 = vst.msk [vmem:[%s6339_s1 + $0x1] ss:$8 sm:$0xc] %vm6_vm4, %v34_v41  }
  0xe2   :  { %2114 = vrot.lane.b32.xlu1 %v2113_v38, %s3466_s28  ;;  %v3299_v46 = vld [vmem:[%s6338_s0 + $0x2] ss:$16 sm:%s2088_s16]   ;;  %2821 = vst.msk [vmem:[%s6339_s1 - $0xe] ss:$8 sm:$0x30] %vm6_vm4, %v34_v41   ;;  %v2086_v6 = vsel %vm250_vm1, %v3298_v40, %v2081_v45  ;;  %v1037_v56 = vpop.permute.xlu0 %1036  }
  0xe3   :  { %2822 = vst.msk [vmem:[%s6339_s1 - $0x1d] ss:$8 sm:$0xc0] %vm6_vm4, %v34_v41   ;;  %v2823_v14 = vld [vmem:[%s6338_s0 + $0xc0] ss:$8 sm:$0xf]   ;;  %v2091_v48 = vsel %vm255_vm2, %v3299_v46, %v2086_v6 }
  0xe4   :  { %v2824_v47 = vld [vmem:[%s6338_s0 + $0xc0] ss:$8 sm:$0xf0]   ;;  %v3310_v3 = vld [vmem:[%s6338_s0 + $0x302] ss:$16 sm:%s5287_s5]   ;;  %s5358_s5 = smov 48  ;;  %2092 = vrot.lane.b32.xlu0 %v2091_v48, %s3466_s28 }
  0xe5   :  { %v49_v51 = vsel %vm4_vm3, %v2824_v47, %v2823_v14  ;;  %v3311_v52 = vld [vmem:[%s6338_s0 + $0x302] ss:$16 sm:%s5289_s21]   ;;  %v2889_v59 = vld [vmem:[%s6338_s0 + $0x380] ss:$8 sm:$0xf]   ;;  %3072 = vst.msk [vmem:[%s6339_s1 + $0x40] sm:$0xff] %vm993_vm7, %v1037_v56  }
  0xe6   :  { %v3312_v55 = vld [vmem:[%s6338_s0 + $0x302] ss:$16 sm:%s2151_s26]   ;;  %s2133_s26 = smov 192  ;;  %2825 = vst.msk [vmem:[%s6339_s1 + $0x14] ss:$8 sm:$0x3] %vm6_vm4, %v49_v51   ;;  %v2149_v57 = vsel %vm245_vm0, %v3311_v52, %v3310_v3  ;;  %v1083_v15 = vpop.permute.xlu0 %1082   ;;  %v1244_v3 = vpop.permute.xlu1 %1243  }
  0xe7   :  { %2826 = vst.msk [vmem:[%s6339_s1 + $0x5] ss:$8 sm:$0xc] %vm6_vm4, %v49_v51   ;;  %2827 = vst.msk [vmem:[%s6339_s1 - $0xa] ss:$8 sm:$0x30] %vm6_vm4, %v49_v51  }
  0xe8   :  { %2828 = vst.msk [vmem:[%s6339_s1 - $0x19] ss:$8 sm:$0xc0] %vm6_vm4, %v49_v51   ;;  %v3313_v58 = vld [vmem:[%s6338_s0 + $0x302] ss:$16 sm:%s5318_s2]   ;;  %s2289_s21 = smov 48 }
  0xe9   :  { %2944 = vst.msk [vmem:[%s6339_s1 + $0x10] sm:$0xff] %vm259_vm6, %v4404_v24   ;;  %2964 = vst.msk [vmem:[%s6339_s1 + $0x18] sm:$0xff] %vm259_vm6, %v4491_v62   ;;  %v2154_v24 = vsel %vm250_vm1, %v3312_v55, %v2149_v57  ;;  %v3305_v62 = vld [vmem:[%s6338_s0 + $0x202] ss:$16 sm:%s5320_s6]   ;;  %s2518_s6 = smov 48 }
  0xea   :  { %v3306_v63 = vld [vmem:[%s6338_s0 + $0x202] ss:$16 sm:%s2123_s27]   ;;  %s5420_s27 = smov 48  ;;  %3023 = vst.msk [vmem:[%s6339_s1 + $0x10] sm:$0xff] %vm626_vm5, %v4975_v53   ;;  %v2159_v53 = vsel %vm255_vm2, %v3313_v58, %v2154_v24  ;;  %3043 = vst.msk [vmem:[%s6339_s1 + $0x18] sm:$0xff] %vm626_vm5, %v5141_v50   ;;  %v1129_v29 = vpop.permute.xlu0 %1128  }
  0xeb   :  { %v2126_v2 = vsel %vm245_vm0, %v3306_v63, %v3305_v62  ;;  %v3307_v4 = vld [vmem:[%s6338_s0 + $0x202] ss:$16 sm:%s5358_s5]   ;;  %3087 = vst.msk [vmem:[%s6339_s1 + $0x28] sm:$0xff] %vm993_vm7, %v1106_v1   ;;  %2160 = vrot.lane.b32.xlu1 %v2159_v53, %s3466_s28 }
  0xec   :  { %v3308_v7 = vld [vmem:[%s6338_s0 + $0x202] ss:$16 sm:%s2133_s26]   ;;  %s5438_s26 = smov 3  ;;  %v2131_v50 = vsel %vm250_vm1, %v3307_v4, %v2126_v2  ;;  %v2890_v28 = vld [vmem:[%s6338_s0 + $0x380] ss:$8 sm:$0xf0]  }
  0xed   :  { %v2895_v60 = vld [vmem:[%s6338_s0 + $0x3c0] ss:$8 sm:$0xf]   ;;  %v2136_v8 = vsel %vm255_vm2, %v3308_v7, %v2131_v50  ;;  %v214_v9 = vsel %vm4_vm3, %v2890_v28, %v2889_v59  ;;  %3082 = vst.msk [vmem:[%s6339_s1 + $0x8] sm:$0xff] %vm993_vm7, %v1083_v15   ;;  %v3320_v22 = vld [vmem:[%s6338_s0 + $0x10a] ss:$16 sm:%s5369_s12]   ;;  %v1290_v7 = vpop.permute.xlu1 %1289  }
  0xee   :  { %v2896_v10 = vld [vmem:[%s6338_s0 + $0x3c0] ss:$8 sm:$0xf0]   ;;  %2137 = vrot.lane.b32.xlu0 %v2136_v8, %s3466_s28  ;;  %2891 = vst.msk [vmem:[%s6339_s1 + $0x70] ss:$8 sm:$0x3] %vm6_vm4, %v214_v9   ;;  %v1175_v43 = vpop.permute.xlu0 %1174  }
  0xef   :  { %v2865_v11 = vld [vmem:[%s6338_s0 + $0x280] ss:$8 sm:$0xf]   ;;  %2892 = vst.msk [vmem:[%s6339_s1 + $0x61] ss:$8 sm:$0xc] %vm6_vm4, %v214_v9   ;;  %v229_v16 = vsel %vm4_vm3, %v2896_v10, %v2895_v60 }
  0xf0   :  { %2893 = vst.msk [vmem:[%s6339_s1 + $0x52] ss:$8 sm:$0x30] %vm6_vm4, %v214_v9   ;;  %2894 = vst.msk [vmem:[%s6339_s1 + $0x43] ss:$8 sm:$0xc0] %vm6_vm4, %v214_v9  }
  0xf1   :  { %v2866_v17 = vld [vmem:[%s6338_s0 + $0x280] ss:$8 sm:$0xf0]   ;;  %2897 = vst.msk [vmem:[%s6339_s1 + $0x74] ss:$8 sm:$0x3] %vm6_vm4, %v229_v16  }
  0xf2   :  { %v2871_v18 = vld [vmem:[%s6338_s0 + $0x2c0] ss:$8 sm:$0xf]   ;;  %2898 = vst.msk [vmem:[%s6339_s1 + $0x65] ss:$8 sm:$0xc] %vm6_vm4, %v229_v16   ;;  %v154_v21 = vsel %vm4_vm3, %v2866_v17, %v2865_v11  ;;  %v1221_v62 = vpop.permute.xlu0 %1220  }
  0xf3   :  { %2899 = vst.msk [vmem:[%s6339_s1 + $0x56] ss:$8 sm:$0x30] %vm6_vm4, %v229_v16   ;;  %2900 = vst.msk [vmem:[%s6339_s1 + $0x47] ss:$8 sm:$0xc0] %vm6_vm4, %v229_v16  }
  0xf4   :  { %v2872_v23 = vld [vmem:[%s6338_s0 + $0x2c0] ss:$8 sm:$0xf0]   ;;  %s2174_s12 = smov 48  ;;  %2959 = vst.msk [vmem:[%s6339_s1 + $0x70] sm:$0xff] %vm259_vm6, %v4418_v31   ;;  %2979 = vst.msk [vmem:[%s6339_s1 + $0x78] sm:$0xff] %vm259_vm6, %v4515_v5  }
  0xf5   :  { %2867 = vst.msk [vmem:[%s6339_s1 + $0x50] ss:$8 sm:$0x3] %vm6_vm4, %v154_v21   ;;  %2868 = vst.msk [vmem:[%s6339_s1 + $0x41] ss:$8 sm:$0xc] %vm6_vm4, %v154_v21   ;;  %v169_v31 = vsel %vm4_vm3, %v2872_v23, %v2871_v18 }
  0xf6   :  { %2869 = vst.msk [vmem:[%s6339_s1 + $0x32] ss:$8 sm:$0x30] %vm6_vm4, %v154_v21   ;;  %2870 = vst.msk [vmem:[%s6339_s1 + $0x23] ss:$8 sm:$0xc0] %vm6_vm4, %v154_v21   ;;  %v1267_v17 = vpop.permute.xlu0 %1266  }
  0xf7   :  { %v3321_v5 = vld [vmem:[%s6338_s0 + $0x10a] ss:$16 sm:%s5396_s7]   ;;  %3097 = vst.msk [vmem:[%s6339_s1 + $0x68] sm:$0xff] %vm993_vm7, %v1152_v54   ;;  %3092 = vst.msk [vmem:[%s6339_s1 + $0x48] sm:$0xff] %vm993_vm7, %v1129_v29  }
  0xf8   :  { %v3322_v25 = vld [vmem:[%s6338_s0 + $0x10a] ss:$16 sm:%s5420_s27]   ;;  %s2179_s27 = smov 192  ;;  %3038 = vst.msk [vmem:[%s6339_s1 + $0x70] sm:$0xff] %vm626_vm5, %v4998_v19   ;;  %v2195_v19 = vsel %vm245_vm0, %v3321_v5, %v3320_v22  ;;  %3058 = vst.msk [vmem:[%s6339_s1 + $0x78] sm:$0xff] %vm626_vm5, %v5163_v0  }
  0xf9   :  { %2873 = vst.msk [vmem:[%s6339_s1 + $0x54] ss:$8 sm:$0x3] %vm6_vm4, %v169_v31   ;;  %2874 = vst.msk [vmem:[%s6339_s1 + $0x45] ss:$8 sm:$0xc] %vm6_vm4, %v169_v31  }
  0xfa   :  { %2875 = vst.msk [vmem:[%s6339_s1 + $0x36] ss:$8 sm:$0x30] %vm6_vm4, %v169_v31   ;;  %2876 = vst.msk [vmem:[%s6339_s1 + $0x27] ss:$8 sm:$0xc0] %vm6_vm4, %v169_v31   ;;  %v1336_v31 = vpop.permute.xlu1 %1335  }
  0xfb   :  { %v3323_v26 = vld [vmem:[%s6338_s0 + $0x10a] ss:$16 sm:%s5422_s18]   ;;  %2954 = vst.msk [vmem:[%s6339_s1 + $0x50] sm:$0xff] %vm259_vm6, %v4440_v42   ;;  %2974 = vst.msk [vmem:[%s6339_s1 + $0x58] sm:$0xff] %vm259_vm6, %v4568_v20   ;;  %v2200_v42 = vsel %vm250_vm1, %v3322_v25, %v2195_v19  ;;  %s2215_s18 = smov 12 }
  0xfc   :  { %v3315_v27 = vld [vmem:[%s6338_s0 + $0xa] ss:$16 sm:%s5438_s26]   ;;  %s2238_s26 = smov 12  ;;  %3033 = vst.msk [vmem:[%s6339_s1 + $0x50] sm:$0xff] %vm626_vm5, %v5047_v33   ;;  %v2205_v33 = vsel %vm255_vm2, %v3323_v26, %v2200_v42  ;;  %3053 = vst.msk [vmem:[%s6339_s1 + $0x58] sm:$0xff] %vm626_vm5, %v5206_v13  }
  0xfd   :  { %v3316_v20 = vld [vmem:[%s6338_s0 + $0xa] ss:$16 sm:%s5440_s29]   ;;  %2206 = vrot.lane.b32.xlu1 %v2205_v33, %s3466_s28  ;;  %3107 = vst.msk [vmem:[%s6339_s1 + $0x30] sm:$0xff] %vm993_vm7, %v1198_v34   ;;  %s2281_s29 = smov 3  ;;  %v1313_v33 = vpop.permute.xlu0 %1312  }
  0xfe   :  { %v3317_v0 = vld [vmem:[%s6338_s0 + $0xa] ss:$16 sm:%s2174_s12]   ;;  %s2243_s12 = smov 48  ;;  %v2172_v30 = vsel %vm245_vm0, %v3316_v20, %v3315_v27  ;;  %3102 = vst.msk [vmem:[%s6339_s1 + $0x10] sm:$0xff] %vm993_vm7, %v1175_v43   ;;  %3117 = vst.msk [vmem:[%s6339_s1 + $0x70] sm:$0xff] %vm993_vm7, %v1244_v3   ;;  %v1381_v34 = vpop.permute.xlu1 %1380  }
  0xff   :  { %v3318_v32 = vld [vmem:[%s6338_s0 + $0xa] ss:$16 sm:%s2179_s27]   ;;  %v2177_v13 = vsel %vm250_vm1, %v3317_v0, %v2172_v30  ;;  %v3340_v6 = vld [vmem:[%s6338_s0 + $0x182] ss:$16 sm:%s2281_s29]   ;;  %s2327_s29 = smov 3 }
 0x100   :  { %v3330_v12 = vld [vmem:[%s6338_s0 + $0x30a] ss:$16 sm:%s2235_s8]   ;;  %s2212_s8 = smov 3  ;;  %v2182_v35 = vsel %vm255_vm2, %v3318_v32, %v2177_v13  ;;  %v3341_v47 = vld [vmem:[%s6338_s0 + $0x182] ss:$16 sm:%s2284_s11]   ;;  %s2330_s11 = smov 12 }
 0x101   :  { %v3331_v49 = vld [vmem:[%s6338_s0 + $0x30a] ss:$16 sm:%s2238_s26]   ;;  %2183 = vrot.lane.b32.xlu0 %v2182_v35, %s3466_s28  ;;  %v2287_v51 = vsel %vm245_vm0, %v3341_v47, %v3340_v6  ;;  %3112 = vst.msk [vmem:[%s6339_s1 + $0x50] sm:$0xff] %vm993_vm7, %v1221_v62   ;;  %v1359_v43 = vpop.permute.xlu0 %1358  }
 0x102   :  { %v2241_v61 = vsel %vm245_vm0, %v3331_v49, %v3330_v12  ;;  %v3332_v36 = vld [vmem:[%s6338_s0 + $0x30a] ss:$16 sm:%s2243_s12]   ;;  %v3342_v52 = vld [vmem:[%s6338_s0 + $0x182] ss:$16 sm:%s2289_s21]   ;;  %s2335_s21 = smov 48  ;;  %v1427_v3 = vpop.permute.xlu1 %1426  }
 0x103   :  { %v3333_v37 = vld [vmem:[%s6338_s0 + $0x30a] ss:$16 sm:%s2248_s3]   ;;  %v2246_v39 = vsel %vm250_vm1, %v3332_v36, %v2241_v61  ;;  %v3343_v55 = vld [vmem:[%s6338_s0 + $0x182] ss:$16 sm:%s2294_s23]   ;;  %v2292_v56 = vsel %vm250_vm1, %v3342_v52, %v2287_v51  ;;  %s2340_s23 = smov 192 }
 0x104   :  { %v3325_v38 = vld [vmem:[%s6338_s0 + $0x20a] ss:$16 sm:%s2212_s8]   ;;  %v2251_v44 = vsel %vm255_vm2, %v3333_v37, %v2246_v39  ;;  %s2258_s8 = smov 3  ;;  %v2297_v58 = vsel %vm255_vm2, %v3343_v55, %v2292_v56  ;;  %v3350_v2 = vld [vmem:[%s6338_s0 + $0x382] ss:$16 sm:%s2327_s29]   ;;  %s2373_s29 = smov 3 }
 0x105   :  { %v3326_v40 = vld [vmem:[%s6338_s0 + $0x20a] ss:$16 sm:%s2215_s18]   ;;  %2252 = vrot.lane.b32.xlu1 %v2251_v44, %s3466_s28  ;;  %s2261_s18 = smov 12  ;;  %3127 = vst.msk [vmem:[%s6339_s1 + $0x38] sm:$0xff] %vm993_vm7, %v1290_v7   ;;  %v1404_v62 = vpop.permute.xlu0 %1403  }
 0x106   :  { %v3327_v41 = vld [vmem:[%s6338_s0 + $0x20a] ss:$16 sm:%s2220_s13]   ;;  %v2218_v45 = vsel %vm245_vm0, %v3326_v40, %v3325_v38  ;;  %s2266_s13 = smov 48  ;;  %v3335_v57 = vld [vmem:[%s6338_s0 + $0x82] ss:$16 sm:%s2258_s8]   ;;  %s2304_s8 = smov 3  ;;  %v1473_v7 = vpop.permute.xlu1 %1472  }
 0x107   :  { %v3328_v46 = vld [vmem:[%s6338_s0 + $0x20a] ss:$16 sm:%s2225_s25]   ;;  %v2223_v14 = vsel %vm250_vm1, %v3327_v41, %v2218_v45  ;;  %s2271_s25 = smov 192  ;;  %v3336_v59 = vld [vmem:[%s6338_s0 + $0x82] ss:$16 sm:%s2261_s18]   ;;  %s2307_s18 = smov 12 }
 0x108   :  { %v2228_v48 = vsel %vm255_vm2, %v3328_v46, %v2223_v14  ;;  %v3337_v24 = vld [vmem:[%s6338_s0 + $0x82] ss:$16 sm:%s2266_s13]   ;;  %v2264_v63 = vsel %vm245_vm0, %v3336_v59, %v3335_v57  ;;  %s2312_s13 = smov 48  ;;  %3122 = vst.msk [vmem:[%s6339_s1 + $0x18] sm:$0xff] %vm993_vm7, %v1267_v17   ;;  %3137 = vst.msk [vmem:[%s6339_s1 + $0x78] sm:$0xff] %vm993_vm7, %v1336_v31  }
 0x109   :  { %2229 = vrot.lane.b32.xlu0 %v2228_v48, %s3466_s28  ;;  %2298 = vrot.lane.b32.xlu1 %v2297_v58, %s3466_s28  ;;  %v3338_v1 = vld [vmem:[%s6338_s0 + $0x82] ss:$16 sm:%s2271_s25]   ;;  %v2269_v53 = vsel %vm250_vm1, %v3337_v24, %v2264_v63  ;;  %s2317_s25 = smov 192  ;;  %v1450_v17 = vpop.permute.xlu0 %1449  }
 0x10a   :  { %v3351_v4 = vld [vmem:[%s6338_s0 + $0x382] ss:$16 sm:%s2330_s11]   ;;  %v2274_v50 = vsel %vm255_vm2, %v3338_v1, %v2269_v53  ;;  %s2376_s11 = smov 12  ;;  %v3360_v22 = vld [vmem:[%s6338_s0 + $0x18a] ss:$16 sm:%s2373_s29]   ;;  %s2419_s29 = smov 3  ;;  %v1519_v31 = vpop.permute.xlu1 %1518  }
 0x10b   :  { %v2333_v28 = vsel %vm245_vm0, %v3351_v4, %v3350_v2  ;;  %v3352_v60 = vld [vmem:[%s6338_s0 + $0x382] ss:$16 sm:%s2335_s21]   ;;  %s2381_s21 = smov 48  ;;  %v3361_v54 = vld [vmem:[%s6338_s0 + $0x18a] ss:$16 sm:%s2376_s11]   ;;  %s2422_s11 = smov 12 }
 0x10c   :  { %v3353_v8 = vld [vmem:[%s6338_s0 + $0x382] ss:$16 sm:%s2340_s23]   ;;  %v2338_v9 = vsel %vm250_vm1, %v3352_v60, %v2333_v28  ;;  %s2386_s23 = smov 192  ;;  %v2379_v25 = vsel %vm245_vm0, %v3361_v54, %v3360_v22  ;;  %v3362_v19 = vld [vmem:[%s6338_s0 + $0x18a] ss:$16 sm:%s2381_s21]   ;;  %s2427_s21 = smov 48 }
 0x10d   :  { %2275 = vrot.lane.b32.xlu0 %v2274_v50, %s3466_s28  ;;  %v3345_v10 = vld [vmem:[%s6338_s0 + $0x282] ss:$16 sm:%s2304_s8]   ;;  %v2343_v11 = vsel %vm255_vm2, %v3353_v8, %v2338_v9  ;;  %s2350_s8 = smov 3  ;;  %v2384_v27 = vsel %vm250_vm1, %v3362_v19, %v2379_v25  ;;  %3132 = vst.msk [vmem:[%s6339_s1 + $0x58] sm:$0xff] %vm993_vm7, %v1313_v33   ;;  %v1496_v33 = vpop.permute.xlu0 %1495  }
 0x10e   :  { %v3346_v15 = vld [vmem:[%s6338_s0 + $0x282] ss:$16 sm:%s2307_s18]   ;;  %2344 = vrot.lane.b32.xlu1 %v2343_v11, %s3466_s28  ;;  %s2353_s18 = smov 12  ;;  %3146 = vst.msk [vmem:[%s6339_s1 + $0x20] sm:$0xff] %vm1360_vm8, %v1381_v34   ;;  %v1565_v34 = vpop.permute.xlu1 %1564  }
 0x10f   :  { %v3347_v16 = vld [vmem:[%s6338_s0 + $0x282] ss:$16 sm:%s2312_s13]   ;;  %v2310_v18 = vsel %vm245_vm0, %v3346_v15, %v3345_v10  ;;  %s2358_s13 = smov 48  ;;  %v3363_v26 = vld [vmem:[%s6338_s0 + $0x18a] ss:$16 sm:%s2386_s23]   ;;  %s2432_s23 = smov 192 }
 0x110   :  { %v3348_v21 = vld [vmem:[%s6338_s0 + $0x282] ss:$16 sm:%s2317_s25]   ;;  %v2315_v23 = vsel %vm250_vm1, %v3347_v16, %v2310_v18  ;;  %s2363_s25 = smov 192  ;;  %v3355_v42 = vld [vmem:[%s6338_s0 + $0x8a] ss:$16 sm:%s2350_s8]   ;;  %v2389_v20 = vsel %vm255_vm2, %v3363_v26, %v2384_v27  ;;  %s2396_s8 = smov 3 }
 0x111   :  { %v2320_v5 = vsel %vm255_vm2, %v3348_v21, %v2315_v23  ;;  %v3356_v0 = vld [vmem:[%s6338_s0 + $0x8a] ss:$16 sm:%s2353_s18]   ;;  %s2399_s18 = smov 12  ;;  %1361 = vst.msk [vmem:[%s6339_s1] sm:$0xff] %vm1360_vm8, %v1359_v43   ;;  %3156 = vst.msk [vmem:[%s6339_s1 + $0x60] sm:$0xff] %vm1360_vm8, %v1427_v3   ;;  %v1542_v43 = vpop.permute.xlu0 %1541  }
 0x112   :  { %2321 = vrot.lane.b32.xlu0 %v2320_v5, %s3466_s28  ;;  %v3357_v29 = vld [vmem:[%s6338_s0 + $0x8a] ss:$16 sm:%s2358_s13]   ;;  %2390 = vrot.lane.b32.xlu1 %v2389_v20, %s3466_s28  ;;  %v2356_v30 = vsel %vm245_vm0, %v3356_v0, %v3355_v42  ;;  %s2404_s13 = smov 48  ;;  %v1611_v3 = vpop.permute.xlu1 %1610  }
 0x113   :  { %v3358_v32 = vld [vmem:[%s6338_s0 + $0x8a] ss:$16 sm:%s2363_s25]   ;;  %v2361_v12 = vsel %vm250_vm1, %v3357_v29, %v2356_v30  ;;  %s2409_s25 = smov 192  ;;  %3151 = vst.msk [vmem:[%s6339_s1 + $0x40] sm:$0xff] %vm1360_vm8, %v1404_v62   ;;  %3166 = vst.msk [vmem:[%s6339_s1 + $0x28] sm:$0xff] %vm1360_vm8, %v1473_v7  }
 0x114   :  { %v3370_v13 = vld [vmem:[%s6338_s0 + $0x38a] ss:$16 sm:%s2419_s29]   ;;  %v2366_v35 = vsel %vm255_vm2, %v3358_v32, %v2361_v12  ;;  %s2464_s29 = smov 3  ;;  %v3389_v2 = vld [vmem:[%s6338_s0 + $0x301] ss:$16 sm:%s2510_s15]   ;;  %s2556_s15 = smov 3 }
 0x115   :  { %v3371_v49 = vld [vmem:[%s6338_s0 + $0x38a] ss:$16 sm:%s2422_s11]   ;;  %s2467_s11 = smov 12  ;;  %v3379_v6 = vld [vmem:[%s6338_s0 + $0x101] ss:$16 sm:%s2464_s29]   ;;  %s2513_s29 = smov 12  ;;  %v1588_v62 = vpop.permute.xlu0 %1587  }
 0x116   :  { %v2425_v61 = vsel %vm245_vm0, %v3371_v49, %v3370_v13  ;;  %v3372_v36 = vld [vmem:[%s6338_s0 + $0x38a] ss:$16 sm:%s2427_s21]   ;;  %2367 = vrot.lane.b32.xlu0 %v2366_v35, %s3466_s28  ;;  %s2472_s21 = smov 48  ;;  %3161 = vst.msk [vmem:[%s6339_s1 + $0x8] sm:$0xff] %vm1360_vm8, %v1450_v17   ;;  %v1657_v7 = vpop.permute.xlu1 %1656  }
 0x117   :  { %v3373_v37 = vld [vmem:[%s6338_s0 + $0x38a] ss:$16 sm:%s2432_s23]   ;;  %v2430_v39 = vsel %vm250_vm1, %v3372_v36, %v2425_v61  ;;  %s2477_s23 = smov 192  ;;  %v3380_v47 = vld [vmem:[%s6338_s0 + $0x101] ss:$16 sm:%s2467_s11]  }
 0x118   :  { %v3365_v38 = vld [vmem:[%s6338_s0 + $0x28a] ss:$16 sm:%s2396_s8]   ;;  %v2435_v44 = vsel %vm255_vm2, %v3373_v37, %v2430_v39  ;;  %s2442_s8 = smov 3  ;;  %v2470_v51 = vsel %vm245_vm0, %v3380_v47, %v3379_v6  ;;  %v3381_v52 = vld [vmem:[%s6338_s0 + $0x101] ss:$16 sm:%s2472_s21]   ;;  %s2523_s21 = smov 192 }
 0x119   :  { %v3366_v40 = vld [vmem:[%s6338_s0 + $0x28a] ss:$16 sm:%s2399_s18]   ;;  %2436 = vrot.lane.b32.xlu1 %v2435_v44, %s3466_s28  ;;  %s2445_s18 = smov 12  ;;  %v2475_v56 = vsel %vm250_vm1, %v3381_v52, %v2470_v51  ;;  %3176 = vst.msk [vmem:[%s6339_s1 + $0x68] sm:$0xff] %vm1360_vm8, %v1519_v31   ;;  %v1634_v17 = vpop.permute.xlu0 %1633  }
 0x11a   :  { %v3367_v41 = vld [vmem:[%s6338_s0 + $0x28a] ss:$16 sm:%s2404_s13]   ;;  %v2402_v45 = vsel %vm245_vm0, %v3366_v40, %v3365_v38  ;;  %s2450_s13 = smov 48  ;;  %v3382_v55 = vld [vmem:[%s6338_s0 + $0x101] ss:$16 sm:%s2477_s23]   ;;  %s3467_s23 = smov 16   ;;  %v1703_v31 = vpop.permute.xlu1 %1702  }
 0x11b   :  { %v3368_v46 = vld [vmem:[%s6338_s0 + $0x28a] ss:$16 sm:%s2409_s25]   ;;  %v2407_v14 = vsel %vm250_vm1, %v3367_v41, %v2402_v45  ;;  %s2455_s25 = smov 192  ;;  %v3375_v57 = vld [vmem:[%s6338_s0 + $0x1] ss:$16 sm:%s2442_s8]   ;;  %v2480_v58 = vsel %vm255_vm2, %v3382_v55, %v2475_v56  ;;  %s2487_s8 = smov 3 }
 0x11c   :  { %v2412_v48 = vsel %vm255_vm2, %v3368_v46, %v2407_v14  ;;  %v3376_v59 = vld [vmem:[%s6338_s0 + $0x1] ss:$16 sm:%s2445_s18]   ;;  %s2490_s18 = smov 12  ;;  %v3399_v22 = vld [vmem:[%s6338_s0 + $0x109] ss:$16 sm:%s2556_s15]   ;;  %s2602_s15 = smov 3 }
 0x11d   :  { %2413 = vrot.lane.b32.xlu0 %v2412_v48, %s3466_s28  ;;  %v3377_v24 = vld [vmem:[%s6338_s0 + $0x1] ss:$16 sm:%s2450_s13]   ;;  %2481 = vrot.lane.b32.xlu1 %v2480_v58, %s3467_s23  ;;  %v2448_v63 = vsel %vm245_vm0, %v3376_v59, %v3375_v57  ;;  %s2495_s13 = smov 48 }
 0x11e   :  { %v3378_v1 = vld [vmem:[%s6338_s0 + $0x1] ss:$16 sm:%s2455_s25]   ;;  %v2453_v53 = vsel %vm250_vm1, %v3377_v24, %v2448_v63  ;;  %s2500_s25 = smov 192  ;;  %3171 = vst.msk [vmem:[%s6339_s1 + $0x48] sm:$0xff] %vm1360_vm8, %v1496_v33   ;;  %3186 = vst.msk [vmem:[%s6339_s1 + $0x30] sm:$0xff] %vm1360_vm8, %v1565_v34   ;;  %v1680_v33 = vpop.permute.xlu0 %1679   ;;  %v1748_v34 = vpop.permute.xlu1 %1747  }
 0x11f   :  { %v3390_v4 = vld [vmem:[%s6338_s0 + $0x301] ss:$16 sm:%s2513_s29]   ;;  %v2458_v50 = vsel %vm255_vm2, %v3378_v1, %v2453_v53  ;;  %s2559_s29 = smov 12  ;;  %v3409_v13 = vld [vmem:[%s6338_s0 + $0x309] ss:$16 sm:%s2602_s15]   ;;  %s2648_s15 = smov 3 }
 0x120   :  { %v2516_v28 = vsel %vm245_vm0, %v3390_v4, %v3389_v2  ;;  %v3391_v60 = vld [vmem:[%s6338_s0 + $0x301] ss:$16 sm:%s2518_s6]   ;;  %s2564_s6 = smov 48  ;;  %v3400_v54 = vld [vmem:[%s6338_s0 + $0x109] ss:$16 sm:%s2559_s29]   ;;  %s2605_s29 = smov 12 }
 0x121   :  { %v3392_v8 = vld [vmem:[%s6338_s0 + $0x301] ss:$16 sm:%s2523_s21]   ;;  %2459 = vrot.lane.b32.xlu0 %v2458_v50, %s3467_s23  ;;  %v2521_v9 = vsel %vm250_vm1, %v3391_v60, %v2516_v28  ;;  %s2569_s21 = smov 192  ;;  %v2562_v25 = vsel %vm245_vm0, %v3400_v54, %v3399_v22  ;;  %3181 = vst.msk [vmem:[%s6339_s1 + $0x10] sm:$0xff] %vm1360_vm8, %v1542_v43  }
 0x122   :  { %v3384_v10 = vld [vmem:[%s6338_s0 + $0x201] ss:$16 sm:%s2487_s8]   ;;  %v2526_v11 = vsel %vm255_vm2, %v3392_v8, %v2521_v9  ;;  %s2533_s8 = smov 3  ;;  %v3401_v19 = vld [vmem:[%s6338_s0 + $0x109] ss:$16 sm:%s2564_s6]   ;;  %s2610_s6 = smov 48  ;;  %v1726_v43 = vpop.permute.xlu0 %1725  }
 0x123   :  { %v3385_v15 = vld [vmem:[%s6338_s0 + $0x201] ss:$16 sm:%s2490_s18]   ;;  %2527 = vrot.lane.b32.xlu1 %v2526_v11, %s3467_s23  ;;  %s2536_s18 = smov 12  ;;  %v2567_v27 = vsel %vm250_vm1, %v3401_v19, %v2562_v25  ;;  %3196 = vst.msk [vmem:[%s6339_s1 + $0x70] sm:$0xff] %vm1360_vm8, %v1611_v3  }
 0x124   :  { %v3386_v16 = vld [vmem:[%s6338_s0 + $0x201] ss:$16 sm:%s2495_s13]   ;;  %v2493_v18 = vsel %vm245_vm0, %v3385_v15, %v3384_v10  ;;  %s2541_s13 = smov 48  ;;  %v3402_v26 = vld [vmem:[%s6338_s0 + $0x109] ss:$16 sm:%s2569_s21]   ;;  %s2615_s21 = smov 192 }
 0x125   :  { %v3387_v21 = vld [vmem:[%s6338_s0 + $0x201] ss:$16 sm:%s2500_s25]   ;;  %v2498_v23 = vsel %vm250_vm1, %v3386_v16, %v2493_v18  ;;  %s2546_s25 = smov 192  ;;  %v3394_v42 = vld [vmem:[%s6338_s0 + $0x9] ss:$16 sm:%s2533_s8]   ;;  %v2572_v20 = vsel %vm255_vm2, %v3402_v26, %v2567_v27  ;;  %s2579_s8 = smov 3 }
 0x126   :  { %v2503_v5 = vsel %vm255_vm2, %v3387_v21, %v2498_v23  ;;  %v3395_v0 = vld [vmem:[%s6338_s0 + $0x9] ss:$16 sm:%s2536_s18]   ;;  %s2582_s18 = smov 12  ;;  %v3419_v6 = vld [vmem:[%s6338_s0 + $0x181] ss:$16 sm:%s2648_s15]   ;;  %s2694_s15 = smov 3  ;;  %v1771_v3 = vpop.permute.xlu0 %1770  }
 0x127   :  { %2504 = vrot.lane.b32.xlu0 %v2503_v5, %s3467_s23  ;;  %v3396_v29 = vld [vmem:[%s6338_s0 + $0x9] ss:$16 sm:%s2541_s13]   ;;  %2573 = vrot.lane.b32.xlu1 %v2572_v20, %s3467_s23  ;;  %v2539_v30 = vsel %vm245_vm0, %v3395_v0, %v3394_v42  ;;  %s2587_s13 = smov 48 }
 0x128   :  { %v3397_v32 = vld [vmem:[%s6338_s0 + $0x9] ss:$16 sm:%s2546_s25]   ;;  %v2544_v12 = vsel %vm250_vm1, %v3396_v29, %v2539_v30  ;;  %s2592_s25 = smov 192  ;;  %3191 = vst.msk [vmem:[%s6339_s1 + $0x50] sm:$0xff] %vm1360_vm8, %v1588_v62   ;;  %3206 = vst.msk [vmem:[%s6339_s1 + $0x38] sm:$0xff] %vm1360_vm8, %v1657_v7  }
 0x129   :  { %v3410_v49 = vld [vmem:[%s6338_s0 + $0x309] ss:$16 sm:%s2605_s29]   ;;  %v2549_v35 = vsel %vm255_vm2, %v3397_v32, %v2544_v12  ;;  %s2651_s29 = smov 12  ;;  %v3429_v2 = vld [vmem:[%s6338_s0 + $0x381] ss:$16 sm:%s2694_s15]   ;;  %s2740_s15 = smov 3 }
 0x12a   :  { %v2608_v61 = vsel %vm245_vm0, %v3410_v49, %v3409_v13  ;;  %v3411_v36 = vld [vmem:[%s6338_s0 + $0x309] ss:$16 sm:%s2610_s6]   ;;  %s2656_s6 = smov 48  ;;  %v3420_v47 = vld [vmem:[%s6338_s0 + $0x181] ss:$16 sm:%s2651_s29]   ;;  %s2697_s29 = smov 12 }
 0x12b   :  { %v3412_v37 = vld [vmem:[%s6338_s0 + $0x309] ss:$16 sm:%s2615_s21]   ;;  %2550 = vrot.lane.b32.xlu0 %v2549_v35, %s3467_s23  ;;  %v2613_v39 = vsel %vm250_vm1, %v3411_v36, %v2608_v61  ;;  %s2661_s21 = smov 192  ;;  %v2654_v51 = vsel %vm245_vm0, %v3420_v47, %v3419_v6  ;;  %3201 = vst.msk [vmem:[%s6339_s1 + $0x18] sm:$0xff] %vm1360_vm8, %v1634_v17   ;;  %v1794_v6 = vpop.permute.xlu1 %1793  }
 0x12c   :  { %v3404_v38 = vld [vmem:[%s6338_s0 + $0x209] ss:$16 sm:%s2579_s8]   ;;  %v2618_v44 = vsel %vm255_vm2, %v3412_v37, %v2613_v39  ;;  %s2625_s8 = smov 3  ;;  %v3421_v52 = vld [vmem:[%s6338_s0 + $0x181] ss:$16 sm:%s2656_s6]   ;;  %s2702_s6 = smov 48 }
 0x12d   :  { %v3405_v40 = vld [vmem:[%s6338_s0 + $0x209] ss:$16 sm:%s2582_s18]   ;;  %2619 = vrot.lane.b32.xlu1 %v2618_v44, %s3467_s23  ;;  %s2628_s18 = smov 12  ;;  %v2659_v56 = vsel %vm250_vm1, %v3421_v52, %v2654_v51  ;;  %3216 = vst.msk [vmem:[%s6339_s1 + $0x78] sm:$0xff] %vm1360_vm8, %v1703_v31   ;;  %v1817_v51 = vpop.permute.xlu0 %1816  }
 0x12e   :  { %v3406_v41 = vld [vmem:[%s6338_s0 + $0x209] ss:$16 sm:%s2587_s13]   ;;  %v2585_v45 = vsel %vm245_vm0, %v3405_v40, %v3404_v38  ;;  %s2633_s13 = smov 48  ;;  %v3422_v55 = vld [vmem:[%s6338_s0 + $0x181] ss:$16 sm:%s2661_s21]   ;;  %s2707_s21 = smov 192 }
 0x12f   :  { %v3407_v46 = vld [vmem:[%s6338_s0 + $0x209] ss:$16 sm:%s2592_s25]   ;;  %v2590_v14 = vsel %vm250_vm1, %v3406_v41, %v2585_v45  ;;  %s2638_s25 = smov 192  ;;  %v3414_v57 = vld [vmem:[%s6338_s0 + $0x81] ss:$16 sm:%s2625_s8]   ;;  %v2664_v58 = vsel %vm255_vm2, %v3422_v55, %v2659_v56  ;;  %s2671_s8 = smov 3 }
 0x130   :  { %v2595_v48 = vsel %vm255_vm2, %v3407_v46, %v2590_v14  ;;  %v3415_v59 = vld [vmem:[%s6338_s0 + $0x81] ss:$16 sm:%s2628_s18]   ;;  %s2674_s18 = smov 12  ;;  %v3439_v22 = vld [vmem:[%s6338_s0 + $0x189] ss:$16 sm:%s2740_s15]   ;;  %s2786_s15 = smov 3 }
 0x131   :  { %2596 = vrot.lane.b32.xlu0 %v2595_v48, %s3467_s23  ;;  %v3416_v24 = vld [vmem:[%s6338_s0 + $0x81] ss:$16 sm:%s2633_s13]   ;;  %2665 = vrot.lane.b32.xlu1 %v2664_v58, %s3467_s23  ;;  %v2631_v63 = vsel %vm245_vm0, %v3415_v59, %v3414_v57  ;;  %s2679_s13 = smov 48  ;;  %v1840_v48 = vpop.permute.xlu1 %1839  }
 0x132   :  { %v3417_v1 = vld [vmem:[%s6338_s0 + $0x81] ss:$16 sm:%s2638_s25]   ;;  %v2636_v53 = vsel %vm250_vm1, %v3416_v24, %v2631_v63  ;;  %s2684_s25 = smov 192  ;;  %3211 = vst.msk [vmem:[%s6339_s1 + $0x58] sm:$0xff] %vm1360_vm8, %v1680_v33  }
 0x133   :  { %v3430_v4 = vld [vmem:[%s6338_s0 + $0x381] ss:$16 sm:%s2697_s29]   ;;  %v2641_v50 = vsel %vm255_vm2, %v3417_v1, %v2636_v53  ;;  %s2743_s29 = smov 12  ;;  %v3449_v13 = vld [vmem:[%s6338_s0 + $0x389] ss:$16 sm:%s2786_s15]   ;;  %v1863_v55 = vpop.permute.xlu0 %1862  }
 0x134   :  { %v2700_v28 = vsel %vm245_vm0, %v3430_v4, %v3429_v2  ;;  %v3431_v60 = vld [vmem:[%s6338_s0 + $0x381] ss:$16 sm:%s2702_s6]   ;;  %s2748_s6 = smov 48  ;;  %v3440_v54 = vld [vmem:[%s6338_s0 + $0x189] ss:$16 sm:%s2743_s29]   ;;  %s2789_s29 = smov 12 }
 0x135   :  { %v3432_v8 = vld [vmem:[%s6338_s0 + $0x381] ss:$16 sm:%s2707_s21]   ;;  %2642 = vrot.lane.b32.xlu0 %v2641_v50, %s3467_s23  ;;  %v2705_v9 = vsel %vm250_vm1, %v3431_v60, %v2700_v28  ;;  %s2753_s21 = smov 192  ;;  %v2746_v25 = vsel %vm245_vm0, %v3440_v54, %v3439_v22  ;;  %3225 = vst.msk [vmem:[%s6339_s1 + $0x20] sm:$0xff] %vm1727_vm9, %v1748_v34   ;;  %v1886_v52 = vpop.permute.xlu1 %1885  }
 0x136   :  { %v3424_v10 = vld [vmem:[%s6338_s0 + $0x281] ss:$16 sm:%s2671_s8]   ;;  %v2710_v11 = vsel %vm255_vm2, %v3432_v8, %v2705_v9  ;;  %s2717_s8 = smov 3  ;;  %v3441_v19 = vld [vmem:[%s6338_s0 + $0x189] ss:$16 sm:%s2748_s6]   ;;  %s2794_s6 = smov 48 }
 0x137   :  { %v3425_v15 = vld [vmem:[%s6338_s0 + $0x281] ss:$16 sm:%s2674_s18]   ;;  %2711 = vrot.lane.b32.xlu1 %v2710_v11, %s3467_s23  ;;  %s2720_s18 = smov 12  ;;  %v2751_v27 = vsel %vm250_vm1, %v3441_v19, %v2746_v25  ;;  %1728 = vst.msk [vmem:[%s6339_s1] sm:$0xff] %vm1727_vm9, %v1726_v43  }
 0x138   :  { %v3426_v16 = vld [vmem:[%s6338_s0 + $0x281] ss:$16 sm:%s2679_s13]   ;;  %v2677_v18 = vsel %vm245_vm0, %v3425_v15, %v3424_v10  ;;  %s2725_s13 = smov 48  ;;  %v3442_v26 = vld [vmem:[%s6338_s0 + $0x189] ss:$16 sm:%s2753_s21]   ;;  %s2799_s21 = smov 192  ;;  %v1909_v57 = vpop.permute.xlu0 %1908  }
 0x139   :  { %v3427_v21 = vld [vmem:[%s6338_s0 + $0x281] ss:$16 sm:%s2684_s25]   ;;  %v2682_v23 = vsel %vm250_vm1, %v3426_v16, %v2677_v18  ;;  %s2730_s25 = smov 192  ;;  %v3434_v42 = vld [vmem:[%s6338_s0 + $0x89] ss:$16 sm:%s2717_s8]   ;;  %v2756_v20 = vsel %vm255_vm2, %v3442_v26, %v2751_v27  ;;  %s2763_s8 = smov 3  ;;  %v1932_v56 = vpop.permute.xlu1 %1931  }
 0x13a   :  { %v2687_v5 = vsel %vm255_vm2, %v3427_v21, %v2682_v23  ;;  %v3435_v0 = vld [vmem:[%s6338_s0 + $0x89] ss:$16 sm:%s2720_s18]   ;;  %s2766_s18 = smov 12  ;;  %3235 = vst.msk [vmem:[%s6339_s1 + $0x60] sm:$0xff] %vm1727_vm9, %v1794_v6   ;;  %3230 = vst.msk [vmem:[%s6339_s1 + $0x40] sm:$0xff] %vm1727_vm9, %v1771_v3  }
 0x13b   :  { %2688 = vrot.lane.b32.xlu0 %v2687_v5, %s3467_s23  ;;  %v3436_v29 = vld [vmem:[%s6338_s0 + $0x89] ss:$16 sm:%s2725_s13]   ;;  %2757 = vrot.lane.b32.xlu1 %v2756_v20, %s3467_s23  ;;  %v2723_v30 = vsel %vm245_vm0, %v3435_v0, %v3434_v42  ;;  %s2771_s13 = smov 48 }
 0x13c   :  { %v3437_v32 = vld [vmem:[%s6338_s0 + $0x89] ss:$16 sm:%s2730_s25]   ;;  %v2728_v12 = vsel %vm250_vm1, %v3436_v29, %v2723_v30  ;;  %s2776_s25 = smov 192  ;;  %3245 = vst.msk [vmem:[%s6339_s1 + $0x28] sm:$0xff] %vm1727_vm9, %v1840_v48   ;;  %3240 = vst.msk [vmem:[%s6339_s1 + $0x8] sm:$0xff] %vm1727_vm9, %v1817_v51  }
 0x13d   :  { %v3450_v49 = vld [vmem:[%s6338_s0 + $0x389] ss:$16 sm:%s2789_s29]   ;;  %v2733_v35 = vsel %vm255_vm2, %v3437_v32, %v2728_v12  ;;  %3255 = vst.msk [vmem:[%s6339_s1 + $0x68] sm:$0xff] %vm1727_vm9, %v1886_v52   ;;  %3250 = vst.msk [vmem:[%s6339_s1 + $0x48] sm:$0xff] %vm1727_vm9, %v1863_v55   ;;  %v1978_v58 = vpop.permute.xlu1 %1977  }
 0x13e   :  { %v2792_v61 = vsel %vm245_vm0, %v3450_v49, %v3449_v13  ;;  %v3451_v36 = vld [vmem:[%s6338_s0 + $0x389] ss:$16 sm:%s2794_s6]   ;;  %3265 = vst.msk [vmem:[%s6339_s1 + $0x30] sm:$0xff] %vm1727_vm9, %v1932_v56   ;;  %3260 = vst.msk [vmem:[%s6339_s1 + $0x10] sm:$0xff] %vm1727_vm9, %v1909_v57  }
 0x13f   :  { %v3452_v37 = vld [vmem:[%s6338_s0 + $0x389] ss:$16 sm:%s2799_s21]   ;;  %2734 = vrot.lane.b32.xlu0 %v2733_v35, %s3467_s23  ;;  %v2797_v39 = vsel %vm250_vm1, %v3451_v36, %v2792_v61  ;;  %3275 = vst.msk [vmem:[%s6339_s1 + $0x70] sm:$0xff] %vm1727_vm9, %v1978_v58  }
 0x140   :  { %v3444_v38 = vld [vmem:[%s6338_s0 + $0x289] ss:$16 sm:%s2763_s8]   ;;  %v2802_v44 = vsel %vm255_vm2, %v3452_v37, %v2797_v39  ;;  %v1955_v59 = vpop.permute.xlu0 %1954  }
 0x141   :  { %v3445_v40 = vld [vmem:[%s6338_s0 + $0x289] ss:$16 sm:%s2766_s18]   ;;  %2803 = vrot.lane.b32.xlu1 %v2802_v44, %s3467_s23  ;;  %3270 = vst.msk [vmem:[%s6339_s1 + $0x50] sm:$0xff] %vm1727_vm9, %v1955_v59  }
 0x142   :  { %v3446_v41 = vld [vmem:[%s6338_s0 + $0x289] ss:$16 sm:%s2771_s13]   ;;  %v2769_v45 = vsel %vm245_vm0, %v3445_v40, %v3444_v38 }
 0x143   :  { %v3447_v46 = vld [vmem:[%s6338_s0 + $0x289] ss:$16 sm:%s2776_s25]   ;;  %v2774_v14 = vsel %vm250_vm1, %v3446_v41, %v2769_v45 }
 0x144   :  { %v2779_v47 = vsel %vm255_vm2, %v3447_v46, %v2774_v14  ;;  %v2024_v24 = vpop.permute.xlu1 %2023  }
 0x145   :  { %2780 = vrot.lane.b32.xlu0 %v2779_v47, %s3467_s23  ;;  %3285 = vst.msk [vmem:[%s6339_s1 + $0x38] sm:$0xff] %vm1727_vm9, %v2024_v24  }
 0x148   :  { %v2001_v62 = vpop.permute.xlu0 %2000  }
 0x149   :  { %3280 = vst.msk [vmem:[%s6339_s1 + $0x18] sm:$0xff] %vm1727_vm9, %v2001_v62  }
 0x14c   :  { %v2070_v63 = vpop.permute.xlu1 %2069  }
 0x14d   :  { %3295 = vst.msk [vmem:[%s6339_s1 + $0x78] sm:$0xff] %vm1727_vm9, %v2070_v63  }
 0x151   :  { %v2047_v1 = vpop.permute.xlu0 %2046  }
 0x152   :  { %3290 = vst.msk [vmem:[%s6339_s1 + $0x58] sm:$0xff] %vm1727_vm9, %v2047_v1  }
 0x154   :  { %v2115_v53 = vpop.permute.xlu1 %2114  }
 0x155   :  { %3304 = vst.msk [vmem:[%s6339_s1 + $0x20] sm:$0xff] %vm2094_vm10, %v2115_v53  }
 0x156   :  { %v2093_v2 = vpop.permute.xlu0 %2092  }
 0x157   :  { %2095 = vst.msk [vmem:[%s6339_s1] sm:$0xff] %vm2094_vm10, %v2093_v2  }
 0x15d   :  { %v2161_v4 = vpop.permute.xlu1 %2160  }
 0x15e   :  { %3314 = vst.msk [vmem:[%s6339_s1 + $0x60] sm:$0xff] %vm2094_vm10, %v2161_v4  }
 0x160   :  { %v2138_v7 = vpop.permute.xlu0 %2137  }
 0x161   :  { %3309 = vst.msk [vmem:[%s6339_s1 + $0x40] sm:$0xff] %vm2094_vm10, %v2138_v7  }
 0x16f   :  { %v2207_v50 = vpop.permute.xlu1 %2206  }
 0x170   :  { %3324 = vst.msk [vmem:[%s6339_s1 + $0x28] sm:$0xff] %vm2094_vm10, %v2207_v50  }
 0x173   :  { %v2184_v28 = vpop.permute.xlu0 %2183  }
 0x174   :  { %3319 = vst.msk [vmem:[%s6339_s1 + $0x8] sm:$0xff] %vm2094_vm10, %v2184_v28  }
 0x177   :  { %v2253_v60 = vpop.permute.xlu1 %2252  }
 0x178   :  { %3334 = vst.msk [vmem:[%s6339_s1 + $0x68] sm:$0xff] %vm2094_vm10, %v2253_v60  }
 0x17b   :  { %v2230_v8 = vpop.permute.xlu0 %2229   ;;  %v2299_v9 = vpop.permute.xlu1 %2298  }
 0x17c   :  { %3329 = vst.msk [vmem:[%s6339_s1 + $0x48] sm:$0xff] %vm2094_vm10, %v2230_v8   ;;  %3344 = vst.msk [vmem:[%s6339_s1 + $0x30] sm:$0xff] %vm2094_vm10, %v2299_v9  }
 0x17f   :  { %v2276_v10 = vpop.permute.xlu0 %2275  }
 0x180   :  { %3339 = vst.msk [vmem:[%s6339_s1 + $0x10] sm:$0xff] %vm2094_vm10, %v2276_v10   ;;  %v2345_v11 = vpop.permute.xlu1 %2344  }
 0x181   :  { %3354 = vst.msk [vmem:[%s6339_s1 + $0x70] sm:$0xff] %vm2094_vm10, %v2345_v11  }
 0x184   :  { %v2322_v15 = vpop.permute.xlu0 %2321   ;;  %v2391_v16 = vpop.permute.xlu1 %2390  }
 0x185   :  { %3349 = vst.msk [vmem:[%s6339_s1 + $0x50] sm:$0xff] %vm2094_vm10, %v2322_v15   ;;  %3364 = vst.msk [vmem:[%s6339_s1 + $0x38] sm:$0xff] %vm2094_vm10, %v2391_v16  }
 0x188   :  { %v2368_v17 = vpop.permute.xlu0 %2367  }
 0x189   :  { %3359 = vst.msk [vmem:[%s6339_s1 + $0x18] sm:$0xff] %vm2094_vm10, %v2368_v17  }
 0x18b   :  { %v2437_v18 = vpop.permute.xlu1 %2436  }
 0x18c   :  { %3374 = vst.msk [vmem:[%s6339_s1 + $0x78] sm:$0xff] %vm2094_vm10, %v2437_v18  }
 0x18f   :  { %v2414_v21 = vpop.permute.xlu0 %2413   ;;  %v2482_v23 = vpop.permute.xlu1 %2481  }
 0x190   :  { %3369 = vst.msk [vmem:[%s6339_s1 + $0x58] sm:$0xff] %vm2094_vm10, %v2414_v21  }
 0x191   :  { %3383 = vst.msk [vmem:[%s6339_s1 + $0x20] sm:$0xff] %vm2461_vm11, %v2482_v23  }
 0x193   :  { %v2460_v22 = vpop.permute.xlu0 %2459  }
 0x194   :  { %2462 = vst.msk [vmem:[%s6339_s1] sm:$0xff] %vm2461_vm11, %v2460_v22  }
 0x195   :  { %v2528_v54 = vpop.permute.xlu1 %2527  }
 0x196   :  { %3393 = vst.msk [vmem:[%s6339_s1 + $0x60] sm:$0xff] %vm2461_vm11, %v2528_v54  }
 0x199   :  { %v2505_v31 = vpop.permute.xlu0 %2504   ;;  %v2574_v5 = vpop.permute.xlu1 %2573  }
 0x19a   :  { %3388 = vst.msk [vmem:[%s6339_s1 + $0x40] sm:$0xff] %vm2461_vm11, %v2505_v31   ;;  %3403 = vst.msk [vmem:[%s6339_s1 + $0x28] sm:$0xff] %vm2461_vm11, %v2574_v5  }
 0x19d   :  { %v2551_v25 = vpop.permute.xlu0 %2550  }
 0x19e   :  { %3398 = vst.msk [vmem:[%s6339_s1 + $0x8] sm:$0xff] %vm2461_vm11, %v2551_v25  }
 0x19f   :  { %v2620_v19 = vpop.permute.xlu1 %2619  }
 0x1a0   :  { %3413 = vst.msk [vmem:[%s6339_s1 + $0x68] sm:$0xff] %vm2461_vm11, %v2620_v19  }
 0x1a3   :  { %v2597_v26 = vpop.permute.xlu0 %2596   ;;  %v2666_v27 = vpop.permute.xlu1 %2665  }
 0x1a4   :  { %3408 = vst.msk [vmem:[%s6339_s1 + $0x48] sm:$0xff] %vm2461_vm11, %v2597_v26   ;;  %3423 = vst.msk [vmem:[%s6339_s1 + $0x30] sm:$0xff] %vm2461_vm11, %v2666_v27  }
 0x1a7   :  { %v2643_v42 = vpop.permute.xlu0 %2642  }
 0x1a8   :  { %3418 = vst.msk [vmem:[%s6339_s1 + $0x10] sm:$0xff] %vm2461_vm11, %v2643_v42  }
 0x1a9   :  { %v2712_v20 = vpop.permute.xlu1 %2711  }
 0x1aa   :  { %3433 = vst.msk [vmem:[%s6339_s1 + $0x70] sm:$0xff] %vm2461_vm11, %v2712_v20  }
 0x1ad   :  { %v2689_v0 = vpop.permute.xlu0 %2688   ;;  %v2758_v29 = vpop.permute.xlu1 %2757  }
 0x1ae   :  { %3428 = vst.msk [vmem:[%s6339_s1 + $0x50] sm:$0xff] %vm2461_vm11, %v2689_v0   ;;  %3443 = vst.msk [vmem:[%s6339_s1 + $0x38] sm:$0xff] %vm2461_vm11, %v2758_v29  }
 0x1b1   :  { %v2735_v33 = vpop.permute.xlu0 %2734  }
 0x1b2   :  { %3438 = vst.msk [vmem:[%s6339_s1 + $0x18] sm:$0xff] %vm2461_vm11, %v2735_v33  }
 0x1b3   :  { %v2804_v30 = vpop.permute.xlu1 %2803  }
 0x1b4   :  { %3453 = vst.msk [vmem:[%s6339_s1 + $0x78] sm:$0xff] %vm2461_vm11, %v2804_v30  }
 0x1b7   :  { %v2781_v32 = vpop.permute.xlu0 %2780  }
 0x1b8   :  { %3448 = vst.msk [vmem:[%s6339_s1 + $0x58] sm:$0xff] %vm2461_vm11, %v2781_v32  }

// kernel: simple_segmentation_forward.1
= control target key start
LH: loop header
LB: loop body
LE: loop exit
PB: predicated region body
PF: predicated region fallthrough
CT: control target
= control target key end

     0   :  { %vm89_vm0 = vcmask 1041408   ;;  %v607_v2 = vmov 0   ;;  %vm82_vm1 = vcmask 293888   ;;  %v608_v12 = vmov 0.0   ;;  %s792_s0 = inlined_call_operand.vmem [shape: bf16[36,128], index: 0, kind: input, shape index: {}]   ;;  %s793_s1 = inlined_call_operand.vmem [shape: bf16[32,36], index: 1, kind: input, shape index: {}]   ;;  %s794_s2 = inlined_call_operand.vmem [shape: f32[32,1], index: 2, kind: input, shape index: {}]   ;;  %s795_s4 = inlined_call_operand.vmem [shape: f32[6,1], index: 4, kind: input, shape index: {}]   ;;  %s796_s5 = inlined_call_operand.vmem [shape: bf16[128,512], index: 5, kind: input, shape index: {}]   ;;  %s797_s3 = inlined_call_operand.vmem [shape: bf16[6,32], index: 3, kind: input, shape index: {}]   ;;  %s798_s6 = inlined_call_operand.vmem [shape: f32[6,512], index: 6, kind: output, shape index: {}]  }
   0x1   :  { %v554_v0 = vld [vmem:[%s792_s0 + $0x10] ss:$0 sps:$4 sm:$0x33]   ;;  %v555_v1 = vld [vmem:[%s792_s0 + $0x8] sm:$0xff]   ;;  %552 = vset.pattern.permute.xlu0 %v607_v2  ;;  %553 = vset.pattern.permute.xlu1 %v607_v2  ;;  %v557_v4 = vld [vmem:[%s793_s1] sm:$0xff]   ;;  %vm609_vm2 = vmmov 0  }
   0x2   :  { %548 = vmatprep.subr.msk.bf16.mxu0 %vm89_vm0, %v554_v0  ;;  %v91_v3 = vsel %vm89_vm0, %v554_v0, 0  ;;  %v556_v5 = vld [vmem:[%s792_s0] sm:$0xff]   ;;  %v35_v6 = vld [vmem:[%s794_s2 + $0x10] sm:$0xff]  ;;  %536 = vmatprep.mubr.msk.bf16.mxu0 %vm82_vm1, %v557_v4  ;;  %v36_v8 = vld [vmem:[%s794_s2 + $0x18] sm:$0xff]  ;;  %vm155_vm3 = vcmask 261120  }
   0x3   :  { %531 = vmatpush3.bf16.msra.mxu0 %v91_v3  ;;  %49 = vperm.xlu0 %552, %v35_v6   ;;  %v33_v7 = vld [vmem:[%s794_s2] sm:$0xff]  ;;  %v34_v9 = vld [vmem:[%s794_s2 + $0x8] sm:$0xff] }
   0x4   :  { %532 = vmatprep.subr.bf16.mxu0 %v555_v1  ;;  %39 = vperm.xlu1 %553, %v33_v7   ;;  %v558_v10 = vld [vmem:[%s793_s1 + $0x8] sm:$0xff]   ;;  %v149_v11 = vld [vmem:[%s795_s4] sm:$0x3f] }
   0x5   :  { %540 = vmatprep.subr.bf16.mxu1 %v608_v12  ;;  %544 = vmatprep.mubr.msk.bf16.mxu1 %vm609_vm2, %v608_v12  ;;  %v562_v13 = vld [vmem:[%s796_s5 + $0xe8] ss:$16 sps:$4 sm:$0xff]   ;;  %v564_v14 = vld [vmem:[%s796_s5 + $0xec] ss:$16 sps:$4 sm:$0xff]   ;;  %v561_v44 = vld [vmem:[%s796_s5 + $0xe4] ss:$16 sps:$4 sm:$0xff]  }
   0x6   :  { %v568_v15 = vld [vmem:[%s796_s5 + $0xc8] ss:$16 sps:$4 sm:$0xff]   ;;  %v570_v16 = vld [vmem:[%s796_s5 + $0xcc] ss:$16 sps:$4 sm:$0xff]   ;;  %v146_v46 = vld [vmem:[%s797_s3] sm:$0x7] }
   0x7   :  { %533 = vmatpush3.bf16.msra.mxu0 %v555_v1  ;;  %54 = vperm.xlu0 %552, %v36_v8   ;;  %v576_v17 = vld [vmem:[%s796_s5 + $0xac] ss:$16 sps:$4 sm:$0xff]   ;;  %v574_v18 = vld [vmem:[%s796_s5 + $0xa8] ss:$16 sps:$4 sm:$0xff]   ;;  %v559_v47 = vld [vmem:[%s796_s5 + $0xe0] ss:$16 sps:$4 sm:$0xff]  }
   0x8   :  { %534 = vmatprep.subr.bf16.mxu0 %v556_v5  ;;  %44 = vperm.xlu1 %553, %v34_v9   ;;  %v582_v19 = vld [vmem:[%s796_s5 + $0x8c] ss:$16 sps:$4 sm:$0xff]   ;;  %v580_v20 = vld [vmem:[%s796_s5 + $0x88] ss:$16 sps:$4 sm:$0xff]   ;;  %v567_v48 = vld [vmem:[%s796_s5 + $0xc4] ss:$16 sps:$4 sm:$0xff]  }
   0x9   :  { %v588_v21 = vld [vmem:[%s796_s5 + $0x6c] ss:$16 sps:$4 sm:$0xff]   ;;  %v586_v22 = vld [vmem:[%s796_s5 + $0x68] ss:$16 sps:$4 sm:$0xff]   ;;  %v565_v49 = vld [vmem:[%s796_s5 + $0xc0] ss:$16 sps:$4 sm:$0xff]  }
   0xa   :  { %v594_v23 = vld [vmem:[%s796_s5 + $0x4c] ss:$16 sps:$4 sm:$0xff]   ;;  %v592_v24 = vld [vmem:[%s796_s5 + $0x48] ss:$16 sps:$4 sm:$0xff]   ;;  %v573_v50 = vld [vmem:[%s796_s5 + $0xa4] ss:$16 sps:$4 sm:$0xff]  }
   0xb   :  { %535 = vmatpush3.bf16.msra.mxu0 %v556_v5  ;;  %152 = vperm.xlu0 %552, %v149_v11   ;;  %v600_v25 = vld [vmem:[%s796_s5 + $0x2c] ss:$16 sps:$4 sm:$0xff]   ;;  %v598_v26 = vld [vmem:[%s796_s5 + $0x28] ss:$16 sps:$4 sm:$0xff]   ;;  %v571_v51 = vld [vmem:[%s796_s5 + $0xa0] ss:$16 sps:$4 sm:$0xff]  }
   0xc   :  { %433 = vmatprep.subr.bf16.mxu0 %v564_v14  ;;  %v579_v52 = vld [vmem:[%s796_s5 + $0x84] ss:$16 sps:$4 sm:$0xff]   ;;  %v577_v53 = vld [vmem:[%s796_s5 + $0x80] ss:$16 sps:$4 sm:$0xff]   ;;  %v606_v61 = vld [vmem:[%s796_s5 + $0xc] ss:$16 sps:$4 sm:$0xff]  }
   0xd   :  { %v585_v54 = vld [vmem:[%s796_s5 + $0x64] ss:$16 sps:$4 sm:$0xff]   ;;  %v583_v55 = vld [vmem:[%s796_s5 + $0x60] ss:$16 sps:$4 sm:$0xff]   ;;  %v604_v63 = vld [vmem:[%s796_s5 + $0x8] ss:$16 sps:$4 sm:$0xff]  }
   0xe   :  { %537 = vmatmul.mubr.msk.bf16.vlgmr.msra.gmra.mxu0 %vm82_vm1, %v558_v10  ;;  %v591_v56 = vld [vmem:[%s796_s5 + $0x44] ss:$16 sps:$4 sm:$0xff]   ;;  %v589_v57 = vld [vmem:[%s796_s5 + $0x40] ss:$16 sps:$4 sm:$0xff]  }
   0xf   :  { %465 = vmatprep.mubr.bf16.mxu0 %v607_v2  ;;  %434 = vmatpush1.bf16.msra.mxu0 %v562_v13  ;;  %v597_v58 = vld [vmem:[%s796_s5 + $0x24] ss:$16 sps:$4 sm:$0xff]   ;;  %v595_v59 = vld [vmem:[%s796_s5 + $0x20] ss:$16 sps:$4 sm:$0xff]  }
  0x10   :  { %435 = vmatprep.subr.bf16.mxu0 %v570_v16  ;;  %v603_v60 = vld [vmem:[%s796_s5 + $0x4] ss:$16 sps:$4 sm:$0xff]   ;;  %v601_v62 = vld [vmem:[%s796_s5] ss:$16 sps:$4 sm:$0xff]  }
  0x13   :  { %436 = vmatpush1.bf16.msra.mxu0 %v568_v15 }
  0x14   :  { %437 = vmatprep.subr.bf16.mxu0 %v576_v17 }
  0x17   :  { %438 = vmatpush1.bf16.msra.mxu0 %v574_v18 }
  0x18   :  { %439 = vmatprep.subr.bf16.mxu0 %v582_v19 }
  0x1b   :  { %440 = vmatpush1.bf16.msra.mxu0 %v580_v20 }
  0x1c   :  { %441 = vmatprep.subr.bf16.mxu0 %v588_v21 }
  0x1f   :  { %442 = vmatpush1.bf16.msra.mxu0 %v586_v22 }
  0x20   :  { %443 = vmatprep.subr.bf16.mxu0 %v594_v23 }
  0x23   :  { %444 = vmatpush1.bf16.msra.mxu0 %v592_v24 }
  0x24   :  { %445 = vmatprep.subr.bf16.mxu0 %v600_v25 }
  0x27   :  { %446 = vmatpush1.bf16.msra.mxu0 %v598_v26 }
  0x28   :  { %447 = vmatprep.subr.bf16.mxu0 %v606_v61 }
  0x2b   :  { %448 = vmatpush1.bf16.msra.mxu0 %v604_v63 }
  0x7e   :  { %v50_v27 = vpop.permute.xlu0 %49 }
  0x7f   :  { %v40_v28 = vpop.permute.xlu1 %39 }
  0x82   :  { %v55_v32 = vpop.permute.xlu0 %54 }
  0x83   :  { %v45_v35 = vpop.permute.xlu1 %44 }
  0x86   :  { %v153_v0 = vpop.permute.xlu0 %152 }
  0xce   :  { %v538_v29 = vpop.f32.mrf.mxu0 }
  0xcf   :  { %v136_v31 = vadd.f32 %v538_v29, %v50_v27 }
  0xd0   :  { %v127_v30 = vpop.f32.mrf.mxu0 }
  0xd1   :  { %v144_v37 = vmax.f32 %v136_v31, 0.0  ;;  %v128_v38 = vadd.f32 %v127_v30, %v40_v28 }
  0xd2   :  { %v539_v33 = vpop.f32.mrf.mxu0 }
  0xd3   :  { %v139_v34 = vadd.f32 %v539_v33, %v55_v32  ;;  %v142_v43 = vmax.f32 %v128_v38, 0.0 }
  0xd4   :  { %v130_v36 = vpop.f32.mrf.mxu0 }
  0xd5   :  { %v145_v39 = vmax.f32 %v139_v34, 0.0  ;;  %v131_v40 = vadd.f32 %v130_v36, %v45_v35 }
  0xd7   :  { %v143_v41 = vmax.f32 %v131_v40, 0.0  ;;  %v148_v42 = vpack.c.bf16 %v145_v39, %v144_v37 }
  0xd9   :  { %541 = vmatpush3.bf16.msra.mxu1 %v148_v42  ;;  %v147_v45 = vpack.c.bf16 %v143_v41, %v142_v43 }
  0xda   :  { %542 = vmatprep.subr.bf16.mxu1 %v608_v12 }
  0xdd   :  { %543 = vmatpush3.bf16.msra.mxu1 %v147_v45 }
  0xde   :  { %392 = vmatprep.subr.bf16.mxu1 %v561_v44 }
  0xe0   :  { %545 = vmatmul.mubr.msk.bf16.vlgmr.msra.gmra.mxu1 %vm155_vm3, %v146_v46 }
  0xe1   :  { %393 = vmatpush1.bf16.msra.mxu1 %v559_v47  ;;  %424 = vmatprep.mubr.bf16.mxu1 %v607_v2 }
  0xe2   :  { %394 = vmatprep.subr.bf16.mxu1 %v567_v48 }
  0xe5   :  { %395 = vmatpush1.bf16.msra.mxu1 %v565_v49 }
  0xe6   :  { %396 = vmatprep.subr.bf16.mxu1 %v573_v50 }
  0xe9   :  { %397 = vmatpush1.bf16.msra.mxu1 %v571_v51 }
  0xea   :  { %398 = vmatprep.subr.bf16.mxu1 %v579_v52 }
  0xed   :  { %399 = vmatpush1.bf16.msra.mxu1 %v577_v53 }
  0xee   :  { %400 = vmatprep.subr.bf16.mxu1 %v585_v54 }
  0xf1   :  { %401 = vmatpush1.bf16.msra.mxu1 %v583_v55 }
  0xf2   :  { %402 = vmatprep.subr.bf16.mxu1 %v591_v56 }
  0xf5   :  { %403 = vmatpush1.bf16.msra.mxu1 %v589_v57 }
  0xf6   :  { %404 = vmatprep.subr.bf16.mxu1 %v597_v58 }
  0xf9   :  { %405 = vmatpush1.bf16.msra.mxu1 %v595_v59 }
  0xfa   :  { %406 = vmatprep.subr.bf16.mxu1 %v603_v60 }
  0xfd   :  { %407 = vmatpush1.bf16.msra.mxu1 %v601_v62 }
 0x1a0   :  { %v193_v1 = vpop.f32.mrf.mxu1 }
 0x1a1   :  { %v194_v2 = vadd.f32 %v193_v1, %v153_v0 }
 0x1a2   :  { %v546_v3 = vpop.f32.mrf.mxu1 }
 0x1a3   :  { %v199_v4 = vpack.c.bf16 %v194_v2, %v194_v2 }
 0x1a4   :  { %v196_v5 = vpop.f32.mrf.mxu1 }
 0x1a5   :  { %425 = vmatmul.mubr.bf16.vlgmr.msra.gmra.mxu1 %v199_v4  ;;  %466 = vmatmul.mubr.bf16.vlgmr.msra.gmra.mxu0 %v199_v4 }
 0x1a6   :  { %v547_v6 = vpop.f32.mrf.mxu1 }
 0x265   :  { %v426_v7 = vpop.f32.mrf.mxu1  ;;  %v467_v8 = vpop.f32.mrf.mxu0 }
 0x266   :  { %474 = vst [vmem:[%s798_s6] sm:$0x3f] %v426_v7  ;;  %476 = vst [vmem:[%s798_s6 + $0x10] sm:$0x3f] %v467_v8 }
 0x267   :  { %v428_v9 = vpop.f32.mrf.mxu1  ;;  %v469_v10 = vpop.f32.mrf.mxu0 }
 0x268   :  { %475 = vst [vmem:[%s798_s6 + $0x8] sm:$0x3f] %v428_v9  ;;  %477 = vst [vmem:[%s798_s6 + $0x18] sm:$0x3f] %v469_v10 }
 0x269   :  { %v430_v11 = vpop.f32.mrf.mxu1  ;;  %v471_v12 = vpop.f32.mrf.mxu0 }
 0x26b   :  { %v431_v13 = vpop.f32.mrf.mxu1  ;;  %v472_v14 = vpop.f32.mrf.mxu0 }

</bundles_post_ra>
